<compile_context>
chip_gen: v7x
topology: tpu7x:2x2x1
jax: 0.10.0
libtpu: 0.0.40
codegen_flags: <defaults>
</compile_context>

<pallas_src>
import math
import jax
import jax.numpy as jnp
from jax import lax
from jax.experimental import pallas as pl
from jax.experimental.pallas import tpu as pltpu

# ----------------------------- config ------------------------------------
B  = 2     # batch
A  = 4     # num_attrs
NB = 16    # n_bins
QF = 8     # query_part_feature_dim
D  = 32    # query_emb_dim
HP = 32    # pooling_mlp_hidden_dim
HF = 32    # ff_mlp_hidden_dim (encoder + graph)
HM = 32    # attn_mlp_hidden_dim (query-part MLP)
H  = 2     # num_attn_heads (encoder + graph)
HD = 16    # attn_head_key_dim   (H * HD == D)
T  = 4     # num_task
ENC_S_LAYERS, ENC_Q_LAYERS, ENC_WT = 1, 1, 1   # num_s/q_attn_layers, weight-tied reps
GRAPH_LAYERS, GRAPH_WT = 1, 1

LN_EPS = 1e-5
PACK = 32          # packed slab width (== D == HP == HF == HM)

assert H * HD == D and D == PACK and HP == PACK and HF == PACK and HM == PACK


# --------------------------- parameters ----------------------------------
def _xavier(key, shape, gain=1.0):
    fan_in, fan_out = shape[0], shape[1]
    limit = gain * math.sqrt(6.0 / (fan_in + fan_out))
    return jax.random.uniform(key, shape, jnp.float32, -limit, limit)


def make_params(key):
    p = {}
    keys = iter(jax.random.split(key, 64))

    def w(name, shape, gain=1.0):
        p[name] = _xavier(next(keys), shape, gain)

    def zeros(name, shape):
        p[name] = jnp.zeros(shape, jnp.float32)

    def ones(name, shape):
        p[name] = jnp.ones(shape, jnp.float32)

    def attn_block(prefix):
        w(f"{prefix}_Wq", (D, H * HD)); w(f"{prefix}_Wk", (D, H * HD))
        w(f"{prefix}_Wv", (D, H * HD)); w(f"{prefix}_Wo", (H * HD, D))
        ones(f"{prefix}_ln1_g", (1, D)); zeros(f"{prefix}_ln1_b", (1, D))
        w(f"{prefix}_ff_W1", (D, HF)); zeros(f"{prefix}_ff_b1", (1, HF))
        w(f"{prefix}_ff_W2", (HF, D)); zeros(f"{prefix}_ff_b2", (1, D))
        ones(f"{prefix}_ln2_g", (1, D)); zeros(f"{prefix}_ln2_b", (1, D))

    # encoder: pooling MLP over histogram bins
    w("pool_W1", (NB, HP)); zeros("pool_b1", (1, HP))
    w("pool_W2", (HP, D));  zeros("pool_b2", (1, D))
    # encoder: attribute self-attention block
    attn_block("s")
    # encoder: query-part feature MLP
    w("qe_W1", (QF, HM)); zeros("qe_b1", (1, HM))
    w("qe_W2", (HM, D));  zeros("qe_b2", (1, D))
    # encoder: query cross-attention block
    attn_block("c")
    # task heads (xavier_uniform with relu gain, as in the PyTorch __init__)
    p["task_heads"] = _xavier(next(keys), (T, D), gain=math.sqrt(2.0))
    # graph attention block
    attn_block("g")
    # graph prediction head
    w("pred_W", (D, 1)); zeros("pred_b", (1, 1))
    return p


# --------------------------- param packing -------------------------------
W_NAMES = [
    "pool_W1", "pool_W2",
    "s_Wq", "s_Wk", "s_Wv", "s_Wo", "s_ff_W1", "s_ff_W2",
    "qe_W1", "qe_W2",
    "c_Wq", "c_Wk", "c_Wv", "c_Wo", "c_ff_W1", "c_ff_W2",
    "g_Wq", "g_Wk", "g_Wv", "g_Wo", "g_ff_W1", "g_ff_W2",
    "task_heads",
]
V_NAMES = [
    "pool_b1", "pool_b2",
    "s_ln1_g", "s_ln1_b", "s_ff_b1", "s_ff_b2", "s_ln2_g", "s_ln2_b",
    "qe_b1", "qe_b2",
    "c_ln1_g", "c_ln1_b", "c_ff_b1", "c_ff_b2", "c_ln2_g", "c_ln2_b",
    "g_ln1_g", "g_ln1_b", "g_ff_b1", "g_ff_b2", "g_ln2_g", "g_ln2_b",
    "pred_w", "pred_b",
]


def pack_params(params):
    """Pack all parameters into two VMEM-friendly slabs (float32).

    Wstack: (NW, PACK, PACK) -- every weight matrix zero-padded to 32x32;
            the 1/sqrt(HD) softmax scale is folded into the *_Wq matrices.
    Vstack: (NV, PACK)       -- bias / LN params / pred head (as a row).
    """
    scale = 1.0 / math.sqrt(HD)
    ws = []
    for n in W_NAMES:
        w = params[n]
        if n.endswith("_Wq"):
            w = w * scale
        r, c = w.shape
        ws.append(jnp.pad(w, ((0, PACK - r), (0, PACK - c))))
    Wstack = jnp.stack(ws, axis=0)

    vs = []
    for n in V_NAMES:
        v = params["pred_W"].T if n == "pred_w" else params[n]   # (1, dim)
        vs.append(jnp.pad(v, ((0, 0), (0, PACK - v.shape[1]))))
    Vstack = jnp.concatenate(vs, axis=0)

    widx = {n: i for i, n in enumerate(W_NAMES)}
    vidx = {n: i for i, n in enumerate(V_NAMES)}
    return Wstack, Vstack, widx, vidx


def build_masks(task_self_attn_mask, data_task_attn_mask):
    """Precompute additive attention masks (hoisted out of the kernel).

    mask_s: (B*A, B*A)  block-diagonal -- attributes attend within sample.
    mask_c: (B,   B*A)  query i attends only to attributes of sample i.
    mask_g: (B*T, B+T)  task j of sample i attends to q_i (per data-task
                        mask) and to tasks (per task-self mask).
    """
    eyeB = jnp.eye(B, dtype=jnp.float32)
    mask_s = jnp.kron(eyeB, jnp.ones((A, A), jnp.float32))
    mask_c = jnp.kron(eyeB, jnp.ones((1, A), jnp.float32))
    data_part = jnp.kron(eyeB, data_task_attn_mask.astype(jnp.float32))   # (B*T, B)
    task_part = jnp.tile(task_self_attn_mask.astype(jnp.float32), (B, 1))  # (B*T, T)
    mask_g = jnp.concatenate([data_part, task_part], axis=1)
    to_add = lambda m: (m - 1.0) * 1e9
    return to_add(mask_s), to_add(mask_c), to_add(mask_g)


# ----------------------------- kernel ------------------------------------
def make_kernel(widx, vidx):
    def kernel(S_ref, Q_ref, ms_ref, mc_ref, mg_ref, W_ref, V_ref, out_ref):
        # --- packed-parameter accessors (static-index ref slices) ---
        def W(name):                      # (PACK, PACK) weight matrix
            return W_ref[widx[name]]

        def V(name):                      # (1, PACK) bias / LN vector
            return V_ref[pl.ds(vidx[name], 1), :]

        def dot(a, b):
            return jnp.dot(a, b, preferred_element_type=jnp.float32)

        def dot_t(a, b):                  # a @ b.T (contract last dims)
            return lax.dot_general(a, b, (((1,), (1,)), ((), ())),
                                   preferred_element_type=jnp.float32)

        def layernorm(x, g, b):
            mean = jnp.mean(x, axis=-1, keepdims=True)
            var = jnp.mean((x - mean) ** 2, axis=-1, keepdims=True)
            return (x - mean) * lax.rsqrt(var + LN_EPS) * g + b

        def mlp2(x, W1, b1, W2, b2):
            h = jnp.maximum(dot(x, W1) + b1, 0.0)
            return dot(h, W2) + b2

        def mha(xq, xkv, p, mask_add):
            # full-width QKV projections (softmax scale folded into Wq)
            q = dot(xq, W(f"{p}_Wq"))                       # (nq, D)
            k = dot(xkv, W(f"{p}_Wk"))                      # (nk, D)
            v = dot(xkv, W(f"{p}_Wv"))                      # (nk, D)
            heads = []
            for hh in range(H):                             # static head loop
                sl = slice(hh * HD, (hh + 1) * HD)
                s = dot_t(q[:, sl], k[:, sl]) + mask_add    # (nq, nk)
                s = s - jnp.max(s, axis=-1, keepdims=True)
                e = jnp.exp(s)
                inv = pl.reciprocal(jnp.sum(e, axis=-1, keepdims=True),
                                    approx=True)
                heads.append(dot(e * inv, v[:, sl]))        # (nq, HD)
            o = jnp.concatenate(heads, axis=-1)             # (nq, D)
            return dot(o, W(f"{p}_Wo"))

        def attn_ff_block(xq, xkv, p, mask_add):
            a = mha(xq, xkv, p, mask_add)
            x = layernorm(xq + a, V(f"{p}_ln1_g"), V(f"{p}_ln1_b"))
            f = mlp2(x, W(f"{p}_ff_W1"), V(f"{p}_ff_b1"),
                     W(f"{p}_ff_W2"), V(f"{p}_ff_b2"))
            return layernorm(x + f, V(f"{p}_ln2_g"), V(f"{p}_ln2_b"))

        # ---------------- Encoder (whole batch, rows stacked) ----------------
        # pooling MLP over padded histograms: (B*A, PACK) -> (B*A, D)
        s = mlp2(S_ref[...], W("pool_W1"), V("pool_b1"),
                 W("pool_W2"), V("pool_b2"))
        ms = ms_ref[...]                                    # (B*A, B*A) block-diag
        for _ in range(ENC_S_LAYERS * ENC_WT):              # weight-tied self-attn
            s = attn_ff_block(s, s, "s", ms)

        # query-part MLP: (B, PACK) -> (B, D)
        q = mlp2(Q_ref[...], W("qe_W1"), V("qe_b1"),
                 W("qe_W2"), V("qe_b2"))
        mc = mc_ref[...]                                    # (B, B*A)
        for _ in range(ENC_Q_LAYERS * ENC_WT):              # weight-tied cross-attn
            q = attn_ff_block(q, s, "c", mc)                # query_embs (B, D)

        # ---------------- Graph ------------------
        th = W("task_heads")[:T, :]                         # (T, D)
        t = jnp.concatenate([th] * B, axis=0)               # (B*T, D) task tokens
        kv = jnp.concatenate([q, th], axis=0)               # (B+T, D) shared keys
        mg = mg_ref[...]                                    # (B*T, B+T)
        for _ in range(GRAPH_LAYERS * GRAPH_WT):
            t = attn_ff_block(t, kv, "g", mg)               # task_embs (B*T, D)

        # prediction head, emitted lane-dense as (1, B*T)
        preds = dot_t(V("pred_w"), t) + V("pred_b")[:, :1]  # (1, B*T)
        out_ref[...] = preds

    return kernel


# ---------------------------- wrapper ------------------------------------
def grela_forward(S, Q, task_self_attn_mask, data_task_attn_mask, params):
    Wstack, Vstack, widx, vidx = pack_params(params)
    mask_s, mask_c, mask_g = build_masks(task_self_attn_mask, data_task_attn_mask)

    # lane-pad the raw inputs so they match the zero-padded packed weights
    S_pad = jnp.pad(S.reshape(B * A, NB).astype(jnp.float32),
                    ((0, 0), (0, PACK - NB)))
    Q_pad = jnp.pad(Q.astype(jnp.float32), ((0, 0), (0, PACK - QF)))

    operands = (S_pad, Q_pad, mask_s, mask_c, mask_g, Wstack, Vstack)

    def full_spec(arr):
        nd = arr.ndim
        return pl.BlockSpec(arr.shape, lambda i, _nd=nd: (0,) * _nd)

    out = pl.pallas_call(
        make_kernel(widx, vidx),
        out_shape=jax.ShapeDtypeStruct((1, B * T), jnp.float32),
        grid=(1,),                                   # single invocation
        in_specs=[full_spec(a) for a in operands],
        out_specs=pl.BlockSpec((1, B * T), lambda i: (0, 0)),
        compiler_params=pltpu.CompilerParams(
            dimension_semantics=("arbitrary",)),
    )(*operands)
    return out.reshape(B, T)


# ------------------------------ main --------------------------------------
if __name__ == "__main__":
    key = jax.random.PRNGKey(0)
    k_param, k_s, k_q = jax.random.split(key, 3)

    params = make_params(k_param)
    S = jax.random.normal(k_s, (B, A, NB), jnp.float32)
    Q = jax.random.normal(k_q, (B, QF), jnp.float32)
    task_self_attn_mask = jnp.ones((T, T), jnp.float32)   # 1 = attend
    data_task_attn_mask = jnp.ones((T, 1), jnp.float32)   # tasks attend to data

    task_preds = grela_forward(S, Q, task_self_attn_mask, data_task_attn_mask, params)
    jax.block_until_ready(task_preds)
    assert task_preds.shape == (B, T)
    assert bool(jnp.all(jnp.isfinite(task_preds)))
    print("KERNEL_OK")
</pallas_src>

<mosaic_0001>
module attributes {stable_mosaic.version = 11 : i64} {
  func.func @kernel(%arg0: i32, %arg1: memref<8x32xf32, #tpu.memory_space<vmem>>, %arg2: memref<2x32xf32, #tpu.memory_space<vmem>>, %arg3: memref<8x8xf32, #tpu.memory_space<vmem>>, %arg4: memref<2x8xf32, #tpu.memory_space<vmem>>, %arg5: memref<8x6xf32, #tpu.memory_space<vmem>>, %arg6: memref<23x32x32xf32, #tpu.memory_space<vmem>>, %arg7: memref<24x32xf32, #tpu.memory_space<vmem>>, %arg8: memref<1x8xf32, #tpu.memory_space<vmem>>) attributes {dimension_semantics = [#tpu.dimension_semantics<arbitrary>], iteration_bounds = array<i64: 1>, scalar_prefetch = 0 : i64, scratch_operands = 0 : i64, tpu.core_type = #tpu.core_type<tc>, window_params = [{pipeline_mode = #tpu.pipeline_mode<synchronous>, transform_indices = @transform_0, window_bounds = array<i64: 8, 32>}, {pipeline_mode = #tpu.pipeline_mode<synchronous>, transform_indices = @transform_1, window_bounds = array<i64: 2, 32>}, {pipeline_mode = #tpu.pipeline_mode<synchronous>, transform_indices = @transform_2, window_bounds = array<i64: 8, 8>}, {pipeline_mode = #tpu.pipeline_mode<synchronous>, transform_indices = @transform_3, window_bounds = array<i64: 2, 8>}, {pipeline_mode = #tpu.pipeline_mode<synchronous>, transform_indices = @transform_4, window_bounds = array<i64: 8, 6>}, {pipeline_mode = #tpu.pipeline_mode<synchronous>, transform_indices = @transform_5, window_bounds = array<i64: 23, 32, 32>}, {pipeline_mode = #tpu.pipeline_mode<synchronous>, transform_indices = @transform_6, window_bounds = array<i64: 24, 32>}, {pipeline_mode = #tpu.pipeline_mode<synchronous>, transform_indices = @transform_7, window_bounds = array<i64: 1, 8>}]} {
    %c0 = arith.constant 0 : index
    %c0_0 = arith.constant 0 : index
    %0 = vector.load %arg1[%c0, %c0_0] : memref<8x32xf32, #tpu.memory_space<vmem>>, vector<8x32xf32>
    %c0_1 = arith.constant 0 : index
    %c0_2 = arith.constant 0 : index
    %c0_3 = arith.constant 0 : index
    %1 = vector.load %arg6[%c0_1, %c0_2, %c0_3] : memref<23x32x32xf32, #tpu.memory_space<vmem>>, vector<1x32x32xf32>
    %2 = vector.shape_cast %1 : vector<1x32x32xf32> to vector<32x32xf32>
    %c0_4 = arith.constant 0 : index
    %c0_5 = arith.constant 0 : index
    %3 = vector.load %arg7[%c0_4, %c0_5] : memref<24x32xf32, #tpu.memory_space<vmem>>, vector<1x32xf32>
    %c1 = arith.constant 1 : index
    %c0_6 = arith.constant 0 : index
    %c0_7 = arith.constant 0 : index
    %4 = vector.load %arg6[%c1, %c0_6, %c0_7] : memref<23x32x32xf32, #tpu.memory_space<vmem>>, vector<1x32x32xf32>
    %5 = vector.shape_cast %4 : vector<1x32x32xf32> to vector<32x32xf32>
    %c1_8 = arith.constant 1 : index
    %c0_9 = arith.constant 0 : index
    %6 = vector.load %arg7[%c1_8, %c0_9] : memref<24x32xf32, #tpu.memory_space<vmem>>, vector<1x32xf32>
    %cst = arith.constant dense<0.000000e+00> : vector<8x32xf32>
    %7 = tpu.matmul %0, %2, %cst {dimension_numbers = #tpu.dot_dimension_numbers<[1], [0], [0], [1], [0, 0, 1, 1], [], []>} : vector<8x32xf32>, vector<32x32xf32>, vector<8x32xf32> -> vector<8x32xf32>
    %8 = vector.broadcast %3 : vector<1x32xf32> to vector<8x32xf32>
    %9 = arith.addf %7, %8 : vector<8x32xf32>
    %cst_10 = arith.constant 0.000000e+00 : f32
    %10 = vector.broadcast %cst_10 : f32 to vector<8x32xf32>
    %11 = arith.maximumf %9, %10 : vector<8x32xf32>
    %cst_11 = arith.constant dense<0.000000e+00> : vector<8x32xf32>
    %12 = tpu.matmul %11, %5, %cst_11 {dimension_numbers = #tpu.dot_dimension_numbers<[1], [0], [0], [1], [0, 0, 1, 1], [], []>} : vector<8x32xf32>, vector<32x32xf32>, vector<8x32xf32> -> vector<8x32xf32>
    %13 = vector.broadcast %6 : vector<1x32xf32> to vector<8x32xf32>
    %14 = arith.addf %12, %13 : vector<8x32xf32>
    %c0_12 = arith.constant 0 : index
    %c0_13 = arith.constant 0 : index
    %15 = vector.load %arg3[%c0_12, %c0_13] : memref<8x8xf32, #tpu.memory_space<vmem>>, vector<8x8xf32>
    %c2 = arith.constant 2 : index
    %c0_14 = arith.constant 0 : index
    %c0_15 = arith.constant 0 : index
    %16 = vector.load %arg6[%c2, %c0_14, %c0_15] : memref<23x32x32xf32, #tpu.memory_space<vmem>>, vector<1x32x32xf32>
    %17 = vector.shape_cast %16 : vector<1x32x32xf32> to vector<32x32xf32>
    %cst_16 = arith.constant dense<0.000000e+00> : vector<8x32xf32>
    %18 = tpu.matmul %14, %17, %cst_16 {dimension_numbers = #tpu.dot_dimension_numbers<[1], [0], [0], [1], [0, 0, 1, 1], [], []>} : vector<8x32xf32>, vector<32x32xf32>, vector<8x32xf32> -> vector<8x32xf32>
    %c3 = arith.constant 3 : index
    %c0_17 = arith.constant 0 : index
    %c0_18 = arith.constant 0 : index
    %19 = vector.load %arg6[%c3, %c0_17, %c0_18] : memref<23x32x32xf32, #tpu.memory_space<vmem>>, vector<1x32x32xf32>
    %20 = vector.shape_cast %19 : vector<1x32x32xf32> to vector<32x32xf32>
    %cst_19 = arith.constant dense<0.000000e+00> : vector<8x32xf32>
    %21 = tpu.matmul %14, %20, %cst_19 {dimension_numbers = #tpu.dot_dimension_numbers<[1], [0], [0], [1], [0, 0, 1, 1], [], []>} : vector<8x32xf32>, vector<32x32xf32>, vector<8x32xf32> -> vector<8x32xf32>
    %c4 = arith.constant 4 : index
    %c0_20 = arith.constant 0 : index
    %c0_21 = arith.constant 0 : index
    %22 = vector.load %arg6[%c4, %c0_20, %c0_21] : memref<23x32x32xf32, #tpu.memory_space<vmem>>, vector<1x32x32xf32>
    %23 = vector.shape_cast %22 : vector<1x32x32xf32> to vector<32x32xf32>
    %cst_22 = arith.constant dense<0.000000e+00> : vector<8x32xf32>
    %24 = tpu.matmul %14, %23, %cst_22 {dimension_numbers = #tpu.dot_dimension_numbers<[1], [0], [0], [1], [0, 0, 1, 1], [], []>} : vector<8x32xf32>, vector<32x32xf32>, vector<8x32xf32> -> vector<8x32xf32>
    %25 = vector.extract_strided_slice %18 {offsets = [0, 0], sizes = [8, 16], strides = [1, 1]} : vector<8x32xf32> to vector<8x16xf32>
    %26 = vector.extract_strided_slice %21 {offsets = [0, 0], sizes = [8, 16], strides = [1, 1]} : vector<8x32xf32> to vector<8x16xf32>
    %cst_23 = arith.constant dense<0.000000e+00> : vector<8x8xf32>
    %27 = tpu.matmul %25, %26, %cst_23 {dimension_numbers = #tpu.dot_dimension_numbers<[1], [1], [0], [0], [0, 0, 1, 0], [], []>} : vector<8x16xf32>, vector<8x16xf32>, vector<8x8xf32> -> vector<8x8xf32>
    %28 = arith.addf %27, %15 : vector<8x8xf32>
    %cst_24 = arith.constant dense<0xFF800000> : vector<8xf32>
    %29 = vector.multi_reduction <maximumf>, %28, %cst_24 [1] : vector<8x8xf32> to vector<8xf32>
    %30 = vector.shape_cast %29 : vector<8xf32> to vector<8x1xf32>
    %31 = vector.broadcast %30 : vector<8x1xf32> to vector<8x8xf32>
    %32 = arith.subf %28, %31 : vector<8x8xf32>
    %33 = math.exp %32 : vector<8x8xf32>
    %cst_25 = arith.constant dense<0.000000e+00> : vector<8xf32>
    %34 = vector.multi_reduction <add>, %33, %cst_25 [1] : vector<8x8xf32> to vector<8xf32>
    %35 = vector.shape_cast %34 : vector<8xf32> to vector<8x1xf32>
    %36 = tpu.reciprocal %35 {approx = true} : vector<8x1xf32> -> vector<8x1xf32>
    %37 = vector.broadcast %36 : vector<8x1xf32> to vector<8x8xf32>
    %38 = arith.mulf %33, %37 : vector<8x8xf32>
    %39 = vector.extract_strided_slice %24 {offsets = [0, 0], sizes = [8, 16], strides = [1, 1]} : vector<8x32xf32> to vector<8x16xf32>
    %cst_26 = arith.constant dense<0.000000e+00> : vector<8x16xf32>
    %40 = tpu.matmul %38, %39, %cst_26 {dimension_numbers = #tpu.dot_dimension_numbers<[1], [0], [0], [1], [0, 0, 1, 1], [], []>} : vector<8x8xf32>, vector<8x16xf32>, vector<8x16xf32> -> vector<8x16xf32>
    %41 = vector.extract_strided_slice %18 {offsets = [0, 16], sizes = [8, 16], strides = [1, 1]} : vector<8x32xf32> to vector<8x16xf32>
    %42 = vector.extract_strided_slice %21 {offsets = [0, 16], sizes = [8, 16], strides = [1, 1]} : vector<8x32xf32> to vector<8x16xf32>
    %cst_27 = arith.constant dense<0.000000e+00> : vector<8x8xf32>
    %43 = tpu.matmul %41, %42, %cst_27 {dimension_numbers = #tpu.dot_dimension_numbers<[1], [1], [0], [0], [0, 0, 1, 0], [], []>} : vector<8x16xf32>, vector<8x16xf32>, vector<8x8xf32> -> vector<8x8xf32>
    %44 = arith.addf %43, %15 : vector<8x8xf32>
    %cst_28 = arith.constant dense<0xFF800000> : vector<8xf32>
    %45 = vector.multi_reduction <maximumf>, %44, %cst_28 [1] : vector<8x8xf32> to vector<8xf32>
    %46 = vector.shape_cast %45 : vector<8xf32> to vector<8x1xf32>
    %47 = vector.broadcast %46 : vector<8x1xf32> to vector<8x8xf32>
    %48 = arith.subf %44, %47 : vector<8x8xf32>
    %49 = math.exp %48 : vector<8x8xf32>
    %cst_29 = arith.constant dense<0.000000e+00> : vector<8xf32>
    %50 = vector.multi_reduction <add>, %49, %cst_29 [1] : vector<8x8xf32> to vector<8xf32>
    %51 = vector.shape_cast %50 : vector<8xf32> to vector<8x1xf32>
    %52 = tpu.reciprocal %51 {approx = true} : vector<8x1xf32> -> vector<8x1xf32>
    %53 = vector.broadcast %52 : vector<8x1xf32> to vector<8x8xf32>
    %54 = arith.mulf %49, %53 : vector<8x8xf32>
    %55 = vector.extract_strided_slice %24 {offsets = [0, 16], sizes = [8, 16], strides = [1, 1]} : vector<8x32xf32> to vector<8x16xf32>
    %cst_30 = arith.constant dense<0.000000e+00> : vector<8x16xf32>
    %56 = tpu.matmul %54, %55, %cst_30 {dimension_numbers = #tpu.dot_dimension_numbers<[1], [0], [0], [1], [0, 0, 1, 1], [], []>} : vector<8x8xf32>, vector<8x16xf32>, vector<8x16xf32> -> vector<8x16xf32>
    %57 = tpu.concatenate %40, %56 in 1 : vector<8x16xf32>, vector<8x16xf32> -> vector<8x32xf32>
    %c5 = arith.constant 5 : index
    %c0_31 = arith.constant 0 : index
    %c0_32 = arith.constant 0 : index
    %58 = vector.load %arg6[%c5, %c0_31, %c0_32] : memref<23x32x32xf32, #tpu.memory_space<vmem>>, vector<1x32x32xf32>
    %59 = vector.shape_cast %58 : vector<1x32x32xf32> to vector<32x32xf32>
    %cst_33 = arith.constant dense<0.000000e+00> : vector<8x32xf32>
    %60 = tpu.matmul %57, %59, %cst_33 {dimension_numbers = #tpu.dot_dimension_numbers<[1], [0], [0], [1], [0, 0, 1, 1], [], []>} : vector<8x32xf32>, vector<32x32xf32>, vector<8x32xf32> -> vector<8x32xf32>
    %61 = arith.addf %14, %60 : vector<8x32xf32>
    %c2_34 = arith.constant 2 : index
    %c0_35 = arith.constant 0 : index
    %62 = vector.load %arg7[%c2_34, %c0_35] : memref<24x32xf32, #tpu.memory_space<vmem>>, vector<1x32xf32>
    %c3_36 = arith.constant 3 : index
    %c0_37 = arith.constant 0 : index
    %63 = vector.load %arg7[%c3_36, %c0_37] : memref<24x32xf32, #tpu.memory_space<vmem>>, vector<1x32xf32>
    %cst_38 = arith.constant dense<0.000000e+00> : vector<8xf32>
    %64 = vector.multi_reduction <add>, %61, %cst_38 [1] : vector<8x32xf32> to vector<8xf32>
    %65 = vector.shape_cast %64 : vector<8xf32> to vector<8x1xf32>
    %cst_39 = arith.constant 3.200000e+01 : f32
    %66 = vector.broadcast %cst_39 : f32 to vector<8x1xf32>
    %67 = arith.divf %65, %66 : vector<8x1xf32>
    %68 = vector.broadcast %67 : vector<8x1xf32> to vector<8x32xf32>
    %69 = arith.subf %61, %68 : vector<8x32xf32>
    %70 = arith.mulf %69, %69 : vector<8x32xf32>
    %cst_40 = arith.constant dense<0.000000e+00> : vector<8xf32>
    %71 = vector.multi_reduction <add>, %70, %cst_40 [1] : vector<8x32xf32> to vector<8xf32>
    %72 = vector.shape_cast %71 : vector<8xf32> to vector<8x1xf32>
    %cst_41 = arith.constant 3.200000e+01 : f32
    %73 = vector.broadcast %cst_41 : f32 to vector<8x1xf32>
    %74 = arith.divf %72, %73 : vector<8x1xf32>
    %75 = vector.broadcast %67 : vector<8x1xf32> to vector<8x32xf32>
    %76 = arith.subf %61, %75 : vector<8x32xf32>
    %cst_42 = arith.constant 9.99999974E-6 : f32
    %77 = vector.broadcast %cst_42 : f32 to vector<8x1xf32>
    %78 = arith.addf %74, %77 : vector<8x1xf32>
    %79 = math.rsqrt %78 : vector<8x1xf32>
    %80 = vector.broadcast %79 : vector<8x1xf32> to vector<8x32xf32>
    %81 = arith.mulf %76, %80 : vector<8x32xf32>
    %82 = vector.broadcast %62 : vector<1x32xf32> to vector<8x32xf32>
    %83 = arith.mulf %81, %82 : vector<8x32xf32>
    %84 = vector.broadcast %63 : vector<1x32xf32> to vector<8x32xf32>
    %85 = arith.addf %83, %84 : vector<8x32xf32>
    %c6 = arith.constant 6 : index
    %c0_43 = arith.constant 0 : index
    %c0_44 = arith.constant 0 : index
    %86 = vector.load %arg6[%c6, %c0_43, %c0_44] : memref<23x32x32xf32, #tpu.memory_space<vmem>>, vector<1x32x32xf32>
    %87 = vector.shape_cast %86 : vector<1x32x32xf32> to vector<32x32xf32>
    %c4_45 = arith.constant 4 : index
    %c0_46 = arith.constant 0 : index
    %88 = vector.load %arg7[%c4_45, %c0_46] : memref<24x32xf32, #tpu.memory_space<vmem>>, vector<1x32xf32>
    %c7 = arith.constant 7 : index
    %c0_47 = arith.constant 0 : index
    %c0_48 = arith.constant 0 : index
    %89 = vector.load %arg6[%c7, %c0_47, %c0_48] : memref<23x32x32xf32, #tpu.memory_space<vmem>>, vector<1x32x32xf32>
    %90 = vector.shape_cast %89 : vector<1x32x32xf32> to vector<32x32xf32>
    %c5_49 = arith.constant 5 : index
    %c0_50 = arith.constant 0 : index
    %91 = vector.load %arg7[%c5_49, %c0_50] : memref<24x32xf32, #tpu.memory_space<vmem>>, vector<1x32xf32>
    %cst_51 = arith.constant dense<0.000000e+00> : vector<8x32xf32>
    %92 = tpu.matmul %85, %87, %cst_51 {dimension_numbers = #tpu.dot_dimension_numbers<[1], [0], [0], [1], [0, 0, 1, 1], [], []>} : vector<8x32xf32>, vector<32x32xf32>, vector<8x32xf32> -> vector<8x32xf32>
    %93 = vector.broadcast %88 : vector<1x32xf32> to vector<8x32xf32>
    %94 = arith.addf %92, %93 : vector<8x32xf32>
    %cst_52 = arith.constant 0.000000e+00 : f32
    %95 = vector.broadcast %cst_52 : f32 to vector<8x32xf32>
    %96 = arith.maximumf %94, %95 : vector<8x32xf32>
    %cst_53 = arith.constant dense<0.000000e+00> : vector<8x32xf32>
    %97 = tpu.matmul %96, %90, %cst_53 {dimension_numbers = #tpu.dot_dimension_numbers<[1], [0], [0], [1], [0, 0, 1, 1], [], []>} : vector<8x32xf32>, vector<32x32xf32>, vector<8x32xf32> -> vector<8x32xf32>
    %98 = vector.broadcast %91 : vector<1x32xf32> to vector<8x32xf32>
    %99 = arith.addf %97, %98 : vector<8x32xf32>
    %100 = arith.addf %85, %99 : vector<8x32xf32>
    %c6_54 = arith.constant 6 : index
    %c0_55 = arith.constant 0 : index
    %101 = vector.load %arg7[%c6_54, %c0_55] : memref<24x32xf32, #tpu.memory_space<vmem>>, vector<1x32xf32>
    %c7_56 = arith.constant 7 : index
    %c0_57 = arith.constant 0 : index
    %102 = vector.load %arg7[%c7_56, %c0_57] : memref<24x32xf32, #tpu.memory_space<vmem>>, vector<1x32xf32>
    %cst_58 = arith.constant dense<0.000000e+00> : vector<8xf32>
    %103 = vector.multi_reduction <add>, %100, %cst_58 [1] : vector<8x32xf32> to vector<8xf32>
    %104 = vector.shape_cast %103 : vector<8xf32> to vector<8x1xf32>
    %cst_59 = arith.constant 3.200000e+01 : f32
    %105 = vector.broadcast %cst_59 : f32 to vector<8x1xf32>
    %106 = arith.divf %104, %105 : vector<8x1xf32>
    %107 = vector.broadcast %106 : vector<8x1xf32> to vector<8x32xf32>
    %108 = arith.subf %100, %107 : vector<8x32xf32>
    %109 = arith.mulf %108, %108 : vector<8x32xf32>
    %cst_60 = arith.constant dense<0.000000e+00> : vector<8xf32>
    %110 = vector.multi_reduction <add>, %109, %cst_60 [1] : vector<8x32xf32> to vector<8xf32>
    %111 = vector.shape_cast %110 : vector<8xf32> to vector<8x1xf32>
    %cst_61 = arith.constant 3.200000e+01 : f32
    %112 = vector.broadcast %cst_61 : f32 to vector<8x1xf32>
    %113 = arith.divf %111, %112 : vector<8x1xf32>
    %114 = vector.broadcast %106 : vector<8x1xf32> to vector<8x32xf32>
    %115 = arith.subf %100, %114 : vector<8x32xf32>
    %cst_62 = arith.constant 9.99999974E-6 : f32
    %116 = vector.broadcast %cst_62 : f32 to vector<8x1xf32>
    %117 = arith.addf %113, %116 : vector<8x1xf32>
    %118 = math.rsqrt %117 : vector<8x1xf32>
    %119 = vector.broadcast %118 : vector<8x1xf32> to vector<8x32xf32>
    %120 = arith.mulf %115, %119 : vector<8x32xf32>
    %121 = vector.broadcast %101 : vector<1x32xf32> to vector<8x32xf32>
    %122 = arith.mulf %120, %121 : vector<8x32xf32>
    %123 = vector.broadcast %102 : vector<1x32xf32> to vector<8x32xf32>
    %124 = arith.addf %122, %123 : vector<8x32xf32>
    %c0_63 = arith.constant 0 : index
    %c0_64 = arith.constant 0 : index
    %125 = vector.load %arg2[%c0_63, %c0_64] : memref<2x32xf32, #tpu.memory_space<vmem>>, vector<2x32xf32>
    %c8 = arith.constant 8 : index
    %c0_65 = arith.constant 0 : index
    %c0_66 = arith.constant 0 : index
    %126 = vector.load %arg6[%c8, %c0_65, %c0_66] : memref<23x32x32xf32, #tpu.memory_space<vmem>>, vector<1x32x32xf32>
    %127 = vector.shape_cast %126 : vector<1x32x32xf32> to vector<32x32xf32>
    %c8_67 = arith.constant 8 : index
    %c0_68 = arith.constant 0 : index
    %128 = vector.load %arg7[%c8_67, %c0_68] : memref<24x32xf32, #tpu.memory_space<vmem>>, vector<1x32xf32>
    %c9 = arith.constant 9 : index
    %c0_69 = arith.constant 0 : index
    %c0_70 = arith.constant 0 : index
    %129 = vector.load %arg6[%c9, %c0_69, %c0_70] : memref<23x32x32xf32, #tpu.memory_space<vmem>>, vector<1x32x32xf32>
    %130 = vector.shape_cast %129 : vector<1x32x32xf32> to vector<32x32xf32>
    %c9_71 = arith.constant 9 : index
    %c0_72 = arith.constant 0 : index
    %131 = vector.load %arg7[%c9_71, %c0_72] : memref<24x32xf32, #tpu.memory_space<vmem>>, vector<1x32xf32>
    %cst_73 = arith.constant dense<0.000000e+00> : vector<2x32xf32>
    %132 = tpu.matmul %125, %127, %cst_73 {dimension_numbers = #tpu.dot_dimension_numbers<[1], [0], [0], [1], [0, 0, 1, 1], [], []>} : vector<2x32xf32>, vector<32x32xf32>, vector<2x32xf32> -> vector<2x32xf32>
    %133 = vector.broadcast %128 : vector<1x32xf32> to vector<2x32xf32>
    %134 = arith.addf %132, %133 : vector<2x32xf32>
    %cst_74 = arith.constant 0.000000e+00 : f32
    %135 = vector.broadcast %cst_74 : f32 to vector<2x32xf32>
    %136 = arith.maximumf %134, %135 : vector<2x32xf32>
    %cst_75 = arith.constant dense<0.000000e+00> : vector<2x32xf32>
    %137 = tpu.matmul %136, %130, %cst_75 {dimension_numbers = #tpu.dot_dimension_numbers<[1], [0], [0], [1], [0, 0, 1, 1], [], []>} : vector<2x32xf32>, vector<32x32xf32>, vector<2x32xf32> -> vector<2x32xf32>
    %138 = vector.broadcast %131 : vector<1x32xf32> to vector<2x32xf32>
    %139 = arith.addf %137, %138 : vector<2x32xf32>
    %c0_76 = arith.constant 0 : index
    %c0_77 = arith.constant 0 : index
    %140 = vector.load %arg4[%c0_76, %c0_77] : memref<2x8xf32, #tpu.memory_space<vmem>>, vector<2x8xf32>
    %c10 = arith.constant 10 : index
    %c0_78 = arith.constant 0 : index
    %c0_79 = arith.constant 0 : index
    %141 = vector.load %arg6[%c10, %c0_78, %c0_79] : memref<23x32x32xf32, #tpu.memory_space<vmem>>, vector<1x32x32xf32>
    %142 = vector.shape_cast %141 : vector<1x32x32xf32> to vector<32x32xf32>
    %cst_80 = arith.constant dense<0.000000e+00> : vector<2x32xf32>
    %143 = tpu.matmul %139, %142, %cst_80 {dimension_numbers = #tpu.dot_dimension_numbers<[1], [0], [0], [1], [0, 0, 1, 1], [], []>} : vector<2x32xf32>, vector<32x32xf32>, vector<2x32xf32> -> vector<2x32xf32>
    %c11 = arith.constant 11 : index
    %c0_81 = arith.constant 0 : index
    %c0_82 = arith.constant 0 : index
    %144 = vector.load %arg6[%c11, %c0_81, %c0_82] : memref<23x32x32xf32, #tpu.memory_space<vmem>>, vector<1x32x32xf32>
    %145 = vector.shape_cast %144 : vector<1x32x32xf32> to vector<32x32xf32>
    %cst_83 = arith.constant dense<0.000000e+00> : vector<8x32xf32>
    %146 = tpu.matmul %124, %145, %cst_83 {dimension_numbers = #tpu.dot_dimension_numbers<[1], [0], [0], [1], [0, 0, 1, 1], [], []>} : vector<8x32xf32>, vector<32x32xf32>, vector<8x32xf32> -> vector<8x32xf32>
    %c12 = arith.constant 12 : index
    %c0_84 = arith.constant 0 : index
    %c0_85 = arith.constant 0 : index
    %147 = vector.load %arg6[%c12, %c0_84, %c0_85] : memref<23x32x32xf32, #tpu.memory_space<vmem>>, vector<1x32x32xf32>
    %148 = vector.shape_cast %147 : vector<1x32x32xf32> to vector<32x32xf32>
    %cst_86 = arith.constant dense<0.000000e+00> : vector<8x32xf32>
    %149 = tpu.matmul %124, %148, %cst_86 {dimension_numbers = #tpu.dot_dimension_numbers<[1], [0], [0], [1], [0, 0, 1, 1], [], []>} : vector<8x32xf32>, vector<32x32xf32>, vector<8x32xf32> -> vector<8x32xf32>
    %150 = vector.extract_strided_slice %143 {offsets = [0, 0], sizes = [2, 16], strides = [1, 1]} : vector<2x32xf32> to vector<2x16xf32>
    %151 = vector.extract_strided_slice %146 {offsets = [0, 0], sizes = [8, 16], strides = [1, 1]} : vector<8x32xf32> to vector<8x16xf32>
    %cst_87 = arith.constant dense<0.000000e+00> : vector<2x8xf32>
    %152 = tpu.matmul %150, %151, %cst_87 {dimension_numbers = #tpu.dot_dimension_numbers<[1], [1], [0], [0], [0, 0, 1, 0], [], []>} : vector<2x16xf32>, vector<8x16xf32>, vector<2x8xf32> -> vector<2x8xf32>
    %153 = arith.addf %152, %140 : vector<2x8xf32>
    %cst_88 = arith.constant dense<0xFF800000> : vector<2xf32>
    %154 = vector.multi_reduction <maximumf>, %153, %cst_88 [1] : vector<2x8xf32> to vector<2xf32>
    %155 = vector.shape_cast %154 : vector<2xf32> to vector<2x1xf32>
    %156 = vector.broadcast %155 : vector<2x1xf32> to vector<2x8xf32>
    %157 = arith.subf %153, %156 : vector<2x8xf32>
    %158 = math.exp %157 : vector<2x8xf32>
    %cst_89 = arith.constant dense<0.000000e+00> : vector<2xf32>
    %159 = vector.multi_reduction <add>, %158, %cst_89 [1] : vector<2x8xf32> to vector<2xf32>
    %160 = vector.shape_cast %159 : vector<2xf32> to vector<2x1xf32>
    %161 = tpu.reciprocal %160 {approx = true} : vector<2x1xf32> -> vector<2x1xf32>
    %162 = vector.broadcast %161 : vector<2x1xf32> to vector<2x8xf32>
    %163 = arith.mulf %158, %162 : vector<2x8xf32>
    %164 = vector.extract_strided_slice %149 {offsets = [0, 0], sizes = [8, 16], strides = [1, 1]} : vector<8x32xf32> to vector<8x16xf32>
    %cst_90 = arith.constant dense<0.000000e+00> : vector<2x16xf32>
    %165 = tpu.matmul %163, %164, %cst_90 {dimension_numbers = #tpu.dot_dimension_numbers<[1], [0], [0], [1], [0, 0, 1, 1], [], []>} : vector<2x8xf32>, vector<8x16xf32>, vector<2x16xf32> -> vector<2x16xf32>
    %166 = vector.extract_strided_slice %143 {offsets = [0, 16], sizes = [2, 16], strides = [1, 1]} : vector<2x32xf32> to vector<2x16xf32>
    %167 = vector.extract_strided_slice %146 {offsets = [0, 16], sizes = [8, 16], strides = [1, 1]} : vector<8x32xf32> to vector<8x16xf32>
    %cst_91 = arith.constant dense<0.000000e+00> : vector<2x8xf32>
    %168 = tpu.matmul %166, %167, %cst_91 {dimension_numbers = #tpu.dot_dimension_numbers<[1], [1], [0], [0], [0, 0, 1, 0], [], []>} : vector<2x16xf32>, vector<8x16xf32>, vector<2x8xf32> -> vector<2x8xf32>
    %169 = arith.addf %168, %140 : vector<2x8xf32>
    %cst_92 = arith.constant dense<0xFF800000> : vector<2xf32>
    %170 = vector.multi_reduction <maximumf>, %169, %cst_92 [1] : vector<2x8xf32> to vector<2xf32>
    %171 = vector.shape_cast %170 : vector<2xf32> to vector<2x1xf32>
    %172 = vector.broadcast %171 : vector<2x1xf32> to vector<2x8xf32>
    %173 = arith.subf %169, %172 : vector<2x8xf32>
    %174 = math.exp %173 : vector<2x8xf32>
    %cst_93 = arith.constant dense<0.000000e+00> : vector<2xf32>
    %175 = vector.multi_reduction <add>, %174, %cst_93 [1] : vector<2x8xf32> to vector<2xf32>
    %176 = vector.shape_cast %175 : vector<2xf32> to vector<2x1xf32>
    %177 = tpu.reciprocal %176 {approx = true} : vector<2x1xf32> -> vector<2x1xf32>
    %178 = vector.broadcast %177 : vector<2x1xf32> to vector<2x8xf32>
    %179 = arith.mulf %174, %178 : vector<2x8xf32>
    %180 = vector.extract_strided_slice %149 {offsets = [0, 16], sizes = [8, 16], strides = [1, 1]} : vector<8x32xf32> to vector<8x16xf32>
    %cst_94 = arith.constant dense<0.000000e+00> : vector<2x16xf32>
    %181 = tpu.matmul %179, %180, %cst_94 {dimension_numbers = #tpu.dot_dimension_numbers<[1], [0], [0], [1], [0, 0, 1, 1], [], []>} : vector<2x8xf32>, vector<8x16xf32>, vector<2x16xf32> -> vector<2x16xf32>
    %182 = tpu.concatenate %165, %181 in 1 : vector<2x16xf32>, vector<2x16xf32> -> vector<2x32xf32>
    %c13 = arith.constant 13 : index
    %c0_95 = arith.constant 0 : index
    %c0_96 = arith.constant 0 : index
    %183 = vector.load %arg6[%c13, %c0_95, %c0_96] : memref<23x32x32xf32, #tpu.memory_space<vmem>>, vector<1x32x32xf32>
    %184 = vector.shape_cast %183 : vector<1x32x32xf32> to vector<32x32xf32>
    %cst_97 = arith.constant dense<0.000000e+00> : vector<2x32xf32>
    %185 = tpu.matmul %182, %184, %cst_97 {dimension_numbers = #tpu.dot_dimension_numbers<[1], [0], [0], [1], [0, 0, 1, 1], [], []>} : vector<2x32xf32>, vector<32x32xf32>, vector<2x32xf32> -> vector<2x32xf32>
    %186 = arith.addf %139, %185 : vector<2x32xf32>
    %c10_98 = arith.constant 10 : index
    %c0_99 = arith.constant 0 : index
    %187 = vector.load %arg7[%c10_98, %c0_99] : memref<24x32xf32, #tpu.memory_space<vmem>>, vector<1x32xf32>
    %c11_100 = arith.constant 11 : index
    %c0_101 = arith.constant 0 : index
    %188 = vector.load %arg7[%c11_100, %c0_101] : memref<24x32xf32, #tpu.memory_space<vmem>>, vector<1x32xf32>
    %cst_102 = arith.constant dense<0.000000e+00> : vector<2xf32>
    %189 = vector.multi_reduction <add>, %186, %cst_102 [1] : vector<2x32xf32> to vector<2xf32>
    %190 = vector.shape_cast %189 : vector<2xf32> to vector<2x1xf32>
    %cst_103 = arith.constant 3.200000e+01 : f32
    %191 = vector.broadcast %cst_103 : f32 to vector<2x1xf32>
    %192 = arith.divf %190, %191 : vector<2x1xf32>
    %193 = vector.broadcast %192 : vector<2x1xf32> to vector<2x32xf32>
    %194 = arith.subf %186, %193 : vector<2x32xf32>
    %195 = arith.mulf %194, %194 : vector<2x32xf32>
    %cst_104 = arith.constant dense<0.000000e+00> : vector<2xf32>
    %196 = vector.multi_reduction <add>, %195, %cst_104 [1] : vector<2x32xf32> to vector<2xf32>
    %197 = vector.shape_cast %196 : vector<2xf32> to vector<2x1xf32>
    %cst_105 = arith.constant 3.200000e+01 : f32
    %198 = vector.broadcast %cst_105 : f32 to vector<2x1xf32>
    %199 = arith.divf %197, %198 : vector<2x1xf32>
    %200 = vector.broadcast %192 : vector<2x1xf32> to vector<2x32xf32>
    %201 = arith.subf %186, %200 : vector<2x32xf32>
    %cst_106 = arith.constant 9.99999974E-6 : f32
    %202 = vector.broadcast %cst_106 : f32 to vector<2x1xf32>
    %203 = arith.addf %199, %202 : vector<2x1xf32>
    %204 = math.rsqrt %203 : vector<2x1xf32>
    %205 = vector.broadcast %204 : vector<2x1xf32> to vector<2x32xf32>
    %206 = arith.mulf %201, %205 : vector<2x32xf32>
    %207 = vector.broadcast %187 : vector<1x32xf32> to vector<2x32xf32>
    %208 = arith.mulf %206, %207 : vector<2x32xf32>
    %209 = vector.broadcast %188 : vector<1x32xf32> to vector<2x32xf32>
    %210 = arith.addf %208, %209 : vector<2x32xf32>
    %c14 = arith.constant 14 : index
    %c0_107 = arith.constant 0 : index
    %c0_108 = arith.constant 0 : index
    %211 = vector.load %arg6[%c14, %c0_107, %c0_108] : memref<23x32x32xf32, #tpu.memory_space<vmem>>, vector<1x32x32xf32>
    %212 = vector.shape_cast %211 : vector<1x32x32xf32> to vector<32x32xf32>
    %c12_109 = arith.constant 12 : index
    %c0_110 = arith.constant 0 : index
    %213 = vector.load %arg7[%c12_109, %c0_110] : memref<24x32xf32, #tpu.memory_space<vmem>>, vector<1x32xf32>
    %c15 = arith.constant 15 : index
    %c0_111 = arith.constant 0 : index
    %c0_112 = arith.constant 0 : index
    %214 = vector.load %arg6[%c15, %c0_111, %c0_112] : memref<23x32x32xf32, #tpu.memory_space<vmem>>, vector<1x32x32xf32>
    %215 = vector.shape_cast %214 : vector<1x32x32xf32> to vector<32x32xf32>
    %c13_113 = arith.constant 13 : index
    %c0_114 = arith.constant 0 : index
    %216 = vector.load %arg7[%c13_113, %c0_114] : memref<24x32xf32, #tpu.memory_space<vmem>>, vector<1x32xf32>
    %cst_115 = arith.constant dense<0.000000e+00> : vector<2x32xf32>
    %217 = tpu.matmul %210, %212, %cst_115 {dimension_numbers = #tpu.dot_dimension_numbers<[1], [0], [0], [1], [0, 0, 1, 1], [], []>} : vector<2x32xf32>, vector<32x32xf32>, vector<2x32xf32> -> vector<2x32xf32>
    %218 = vector.broadcast %213 : vector<1x32xf32> to vector<2x32xf32>
    %219 = arith.addf %217, %218 : vector<2x32xf32>
    %cst_116 = arith.constant 0.000000e+00 : f32
    %220 = vector.broadcast %cst_116 : f32 to vector<2x32xf32>
    %221 = arith.maximumf %219, %220 : vector<2x32xf32>
    %cst_117 = arith.constant dense<0.000000e+00> : vector<2x32xf32>
    %222 = tpu.matmul %221, %215, %cst_117 {dimension_numbers = #tpu.dot_dimension_numbers<[1], [0], [0], [1], [0, 0, 1, 1], [], []>} : vector<2x32xf32>, vector<32x32xf32>, vector<2x32xf32> -> vector<2x32xf32>
    %223 = vector.broadcast %216 : vector<1x32xf32> to vector<2x32xf32>
    %224 = arith.addf %222, %223 : vector<2x32xf32>
    %225 = arith.addf %210, %224 : vector<2x32xf32>
    %c14_118 = arith.constant 14 : index
    %c0_119 = arith.constant 0 : index
    %226 = vector.load %arg7[%c14_118, %c0_119] : memref<24x32xf32, #tpu.memory_space<vmem>>, vector<1x32xf32>
    %c15_120 = arith.constant 15 : index
    %c0_121 = arith.constant 0 : index
    %227 = vector.load %arg7[%c15_120, %c0_121] : memref<24x32xf32, #tpu.memory_space<vmem>>, vector<1x32xf32>
    %cst_122 = arith.constant dense<0.000000e+00> : vector<2xf32>
    %228 = vector.multi_reduction <add>, %225, %cst_122 [1] : vector<2x32xf32> to vector<2xf32>
    %229 = vector.shape_cast %228 : vector<2xf32> to vector<2x1xf32>
    %cst_123 = arith.constant 3.200000e+01 : f32
    %230 = vector.broadcast %cst_123 : f32 to vector<2x1xf32>
    %231 = arith.divf %229, %230 : vector<2x1xf32>
    %232 = vector.broadcast %231 : vector<2x1xf32> to vector<2x32xf32>
    %233 = arith.subf %225, %232 : vector<2x32xf32>
    %234 = arith.mulf %233, %233 : vector<2x32xf32>
    %cst_124 = arith.constant dense<0.000000e+00> : vector<2xf32>
    %235 = vector.multi_reduction <add>, %234, %cst_124 [1] : vector<2x32xf32> to vector<2xf32>
    %236 = vector.shape_cast %235 : vector<2xf32> to vector<2x1xf32>
    %cst_125 = arith.constant 3.200000e+01 : f32
    %237 = vector.broadcast %cst_125 : f32 to vector<2x1xf32>
    %238 = arith.divf %236, %237 : vector<2x1xf32>
    %239 = vector.broadcast %231 : vector<2x1xf32> to vector<2x32xf32>
    %240 = arith.subf %225, %239 : vector<2x32xf32>
    %cst_126 = arith.constant 9.99999974E-6 : f32
    %241 = vector.broadcast %cst_126 : f32 to vector<2x1xf32>
    %242 = arith.addf %238, %241 : vector<2x1xf32>
    %243 = math.rsqrt %242 : vector<2x1xf32>
    %244 = vector.broadcast %243 : vector<2x1xf32> to vector<2x32xf32>
    %245 = arith.mulf %240, %244 : vector<2x32xf32>
    %246 = vector.broadcast %226 : vector<1x32xf32> to vector<2x32xf32>
    %247 = arith.mulf %245, %246 : vector<2x32xf32>
    %248 = vector.broadcast %227 : vector<1x32xf32> to vector<2x32xf32>
    %249 = arith.addf %247, %248 : vector<2x32xf32>
    %c22 = arith.constant 22 : index
    %c0_127 = arith.constant 0 : index
    %c0_128 = arith.constant 0 : index
    %250 = vector.load %arg6[%c22, %c0_127, %c0_128] : memref<23x32x32xf32, #tpu.memory_space<vmem>>, vector<1x32x32xf32>
    %251 = vector.shape_cast %250 : vector<1x32x32xf32> to vector<32x32xf32>
    %252 = vector.extract_strided_slice %251 {offsets = [0, 0], sizes = [4, 32], strides = [1, 1]} : vector<32x32xf32> to vector<4x32xf32>
    %253 = tpu.concatenate %252, %252 in 0 : vector<4x32xf32>, vector<4x32xf32> -> vector<8x32xf32>
    %254 = tpu.concatenate %249, %252 in 0 : vector<2x32xf32>, vector<4x32xf32> -> vector<6x32xf32>
    %c0_129 = arith.constant 0 : index
    %c0_130 = arith.constant 0 : index
    %255 = vector.load %arg5[%c0_129, %c0_130] : memref<8x6xf32, #tpu.memory_space<vmem>>, vector<8x6xf32>
    %c16 = arith.constant 16 : index
    %c0_131 = arith.constant 0 : index
    %c0_132 = arith.constant 0 : index
    %256 = vector.load %arg6[%c16, %c0_131, %c0_132] : memref<23x32x32xf32, #tpu.memory_space<vmem>>, vector<1x32x32xf32>
    %257 = vector.shape_cast %256 : vector<1x32x32xf32> to vector<32x32xf32>
    %cst_133 = arith.constant dense<0.000000e+00> : vector<8x32xf32>
    %258 = tpu.matmul %253, %257, %cst_133 {dimension_numbers = #tpu.dot_dimension_numbers<[1], [0], [0], [1], [0, 0, 1, 1], [], []>} : vector<8x32xf32>, vector<32x32xf32>, vector<8x32xf32> -> vector<8x32xf32>
    %c17 = arith.constant 17 : index
    %c0_134 = arith.constant 0 : index
    %c0_135 = arith.constant 0 : index
    %259 = vector.load %arg6[%c17, %c0_134, %c0_135] : memref<23x32x32xf32, #tpu.memory_space<vmem>>, vector<1x32x32xf32>
    %260 = vector.shape_cast %259 : vector<1x32x32xf32> to vector<32x32xf32>
    %cst_136 = arith.constant dense<0.000000e+00> : vector<6x32xf32>
    %261 = tpu.matmul %254, %260, %cst_136 {dimension_numbers = #tpu.dot_dimension_numbers<[1], [0], [0], [1], [0, 0, 1, 1], [], []>} : vector<6x32xf32>, vector<32x32xf32>, vector<6x32xf32> -> vector<6x32xf32>
    %c18 = arith.constant 18 : index
    %c0_137 = arith.constant 0 : index
    %c0_138 = arith.constant 0 : index
    %262 = vector.load %arg6[%c18, %c0_137, %c0_138] : memref<23x32x32xf32, #tpu.memory_space<vmem>>, vector<1x32x32xf32>
    %263 = vector.shape_cast %262 : vector<1x32x32xf32> to vector<32x32xf32>
    %cst_139 = arith.constant dense<0.000000e+00> : vector<6x32xf32>
    %264 = tpu.matmul %254, %263, %cst_139 {dimension_numbers = #tpu.dot_dimension_numbers<[1], [0], [0], [1], [0, 0, 1, 1], [], []>} : vector<6x32xf32>, vector<32x32xf32>, vector<6x32xf32> -> vector<6x32xf32>
    %265 = vector.extract_strided_slice %258 {offsets = [0, 0], sizes = [8, 16], strides = [1, 1]} : vector<8x32xf32> to vector<8x16xf32>
    %266 = vector.extract_strided_slice %261 {offsets = [0, 0], sizes = [6, 16], strides = [1, 1]} : vector<6x32xf32> to vector<6x16xf32>
    %cst_140 = arith.constant dense<0.000000e+00> : vector<8x6xf32>
    %267 = tpu.matmul %265, %266, %cst_140 {dimension_numbers = #tpu.dot_dimension_numbers<[1], [1], [0], [0], [0, 0, 1, 0], [], []>} : vector<8x16xf32>, vector<6x16xf32>, vector<8x6xf32> -> vector<8x6xf32>
    %268 = arith.addf %267, %255 : vector<8x6xf32>
    %cst_141 = arith.constant dense<0xFF800000> : vector<8xf32>
    %269 = vector.multi_reduction <maximumf>, %268, %cst_141 [1] : vector<8x6xf32> to vector<8xf32>
    %270 = vector.shape_cast %269 : vector<8xf32> to vector<8x1xf32>
    %271 = vector.broadcast %270 : vector<8x1xf32> to vector<8x6xf32>
    %272 = arith.subf %268, %271 : vector<8x6xf32>
    %273 = math.exp %272 : vector<8x6xf32>
    %cst_142 = arith.constant dense<0.000000e+00> : vector<8xf32>
    %274 = vector.multi_reduction <add>, %273, %cst_142 [1] : vector<8x6xf32> to vector<8xf32>
    %275 = vector.shape_cast %274 : vector<8xf32> to vector<8x1xf32>
    %276 = tpu.reciprocal %275 {approx = true} : vector<8x1xf32> -> vector<8x1xf32>
    %277 = vector.broadcast %276 : vector<8x1xf32> to vector<8x6xf32>
    %278 = arith.mulf %273, %277 : vector<8x6xf32>
    %279 = vector.extract_strided_slice %264 {offsets = [0, 0], sizes = [6, 16], strides = [1, 1]} : vector<6x32xf32> to vector<6x16xf32>
    %cst_143 = arith.constant dense<0.000000e+00> : vector<8x16xf32>
    %280 = tpu.matmul %278, %279, %cst_143 {dimension_numbers = #tpu.dot_dimension_numbers<[1], [0], [0], [1], [0, 0, 1, 1], [], []>} : vector<8x6xf32>, vector<6x16xf32>, vector<8x16xf32> -> vector<8x16xf32>
    %281 = vector.extract_strided_slice %258 {offsets = [0, 16], sizes = [8, 16], strides = [1, 1]} : vector<8x32xf32> to vector<8x16xf32>
    %282 = vector.extract_strided_slice %261 {offsets = [0, 16], sizes = [6, 16], strides = [1, 1]} : vector<6x32xf32> to vector<6x16xf32>
    %cst_144 = arith.constant dense<0.000000e+00> : vector<8x6xf32>
    %283 = tpu.matmul %281, %282, %cst_144 {dimension_numbers = #tpu.dot_dimension_numbers<[1], [1], [0], [0], [0, 0, 1, 0], [], []>} : vector<8x16xf32>, vector<6x16xf32>, vector<8x6xf32> -> vector<8x6xf32>
    %284 = arith.addf %283, %255 : vector<8x6xf32>
    %cst_145 = arith.constant dense<0xFF800000> : vector<8xf32>
    %285 = vector.multi_reduction <maximumf>, %284, %cst_145 [1] : vector<8x6xf32> to vector<8xf32>
    %286 = vector.shape_cast %285 : vector<8xf32> to vector<8x1xf32>
    %287 = vector.broadcast %286 : vector<8x1xf32> to vector<8x6xf32>
    %288 = arith.subf %284, %287 : vector<8x6xf32>
    %289 = math.exp %288 : vector<8x6xf32>
    %cst_146 = arith.constant dense<0.000000e+00> : vector<8xf32>
    %290 = vector.multi_reduction <add>, %289, %cst_146 [1] : vector<8x6xf32> to vector<8xf32>
    %291 = vector.shape_cast %290 : vector<8xf32> to vector<8x1xf32>
    %292 = tpu.reciprocal %291 {approx = true} : vector<8x1xf32> -> vector<8x1xf32>
    %293 = vector.broadcast %292 : vector<8x1xf32> to vector<8x6xf32>
    %294 = arith.mulf %289, %293 : vector<8x6xf32>
    %295 = vector.extract_strided_slice %264 {offsets = [0, 16], sizes = [6, 16], strides = [1, 1]} : vector<6x32xf32> to vector<6x16xf32>
    %cst_147 = arith.constant dense<0.000000e+00> : vector<8x16xf32>
    %296 = tpu.matmul %294, %295, %cst_147 {dimension_numbers = #tpu.dot_dimension_numbers<[1], [0], [0], [1], [0, 0, 1, 1], [], []>} : vector<8x6xf32>, vector<6x16xf32>, vector<8x16xf32> -> vector<8x16xf32>
    %297 = tpu.concatenate %280, %296 in 1 : vector<8x16xf32>, vector<8x16xf32> -> vector<8x32xf32>
    %c19 = arith.constant 19 : index
    %c0_148 = arith.constant 0 : index
    %c0_149 = arith.constant 0 : index
    %298 = vector.load %arg6[%c19, %c0_148, %c0_149] : memref<23x32x32xf32, #tpu.memory_space<vmem>>, vector<1x32x32xf32>
    %299 = vector.shape_cast %298 : vector<1x32x32xf32> to vector<32x32xf32>
    %cst_150 = arith.constant dense<0.000000e+00> : vector<8x32xf32>
    %300 = tpu.matmul %297, %299, %cst_150 {dimension_numbers = #tpu.dot_dimension_numbers<[1], [0], [0], [1], [0, 0, 1, 1], [], []>} : vector<8x32xf32>, vector<32x32xf32>, vector<8x32xf32> -> vector<8x32xf32>
    %301 = arith.addf %253, %300 : vector<8x32xf32>
    %c16_151 = arith.constant 16 : index
    %c0_152 = arith.constant 0 : index
    %302 = vector.load %arg7[%c16_151, %c0_152] : memref<24x32xf32, #tpu.memory_space<vmem>>, vector<1x32xf32>
    %c17_153 = arith.constant 17 : index
    %c0_154 = arith.constant 0 : index
    %303 = vector.load %arg7[%c17_153, %c0_154] : memref<24x32xf32, #tpu.memory_space<vmem>>, vector<1x32xf32>
    %cst_155 = arith.constant dense<0.000000e+00> : vector<8xf32>
    %304 = vector.multi_reduction <add>, %301, %cst_155 [1] : vector<8x32xf32> to vector<8xf32>
    %305 = vector.shape_cast %304 : vector<8xf32> to vector<8x1xf32>
    %cst_156 = arith.constant 3.200000e+01 : f32
    %306 = vector.broadcast %cst_156 : f32 to vector<8x1xf32>
    %307 = arith.divf %305, %306 : vector<8x1xf32>
    %308 = vector.broadcast %307 : vector<8x1xf32> to vector<8x32xf32>
    %309 = arith.subf %301, %308 : vector<8x32xf32>
    %310 = arith.mulf %309, %309 : vector<8x32xf32>
    %cst_157 = arith.constant dense<0.000000e+00> : vector<8xf32>
    %311 = vector.multi_reduction <add>, %310, %cst_157 [1] : vector<8x32xf32> to vector<8xf32>
    %312 = vector.shape_cast %311 : vector<8xf32> to vector<8x1xf32>
    %cst_158 = arith.constant 3.200000e+01 : f32
    %313 = vector.broadcast %cst_158 : f32 to vector<8x1xf32>
    %314 = arith.divf %312, %313 : vector<8x1xf32>
    %315 = vector.broadcast %307 : vector<8x1xf32> to vector<8x32xf32>
    %316 = arith.subf %301, %315 : vector<8x32xf32>
    %cst_159 = arith.constant 9.99999974E-6 : f32
    %317 = vector.broadcast %cst_159 : f32 to vector<8x1xf32>
    %318 = arith.addf %314, %317 : vector<8x1xf32>
    %319 = math.rsqrt %318 : vector<8x1xf32>
    %320 = vector.broadcast %319 : vector<8x1xf32> to vector<8x32xf32>
    %321 = arith.mulf %316, %320 : vector<8x32xf32>
    %322 = vector.broadcast %302 : vector<1x32xf32> to vector<8x32xf32>
    %323 = arith.mulf %321, %322 : vector<8x32xf32>
    %324 = vector.broadcast %303 : vector<1x32xf32> to vector<8x32xf32>
    %325 = arith.addf %323, %324 : vector<8x32xf32>
    %c20 = arith.constant 20 : index
    %c0_160 = arith.constant 0 : index
    %c0_161 = arith.constant 0 : index
    %326 = vector.load %arg6[%c20, %c0_160, %c0_161] : memref<23x32x32xf32, #tpu.memory_space<vmem>>, vector<1x32x32xf32>
    %327 = vector.shape_cast %326 : vector<1x32x32xf32> to vector<32x32xf32>
    %c18_162 = arith.constant 18 : index
    %c0_163 = arith.constant 0 : index
    %328 = vector.load %arg7[%c18_162, %c0_163] : memref<24x32xf32, #tpu.memory_space<vmem>>, vector<1x32xf32>
    %c21 = arith.constant 21 : index
    %c0_164 = arith.constant 0 : index
    %c0_165 = arith.constant 0 : index
    %329 = vector.load %arg6[%c21, %c0_164, %c0_165] : memref<23x32x32xf32, #tpu.memory_space<vmem>>, vector<1x32x32xf32>
    %330 = vector.shape_cast %329 : vector<1x32x32xf32> to vector<32x32xf32>
    %c19_166 = arith.constant 19 : index
    %c0_167 = arith.constant 0 : index
    %331 = vector.load %arg7[%c19_166, %c0_167] : memref<24x32xf32, #tpu.memory_space<vmem>>, vector<1x32xf32>
    %cst_168 = arith.constant dense<0.000000e+00> : vector<8x32xf32>
    %332 = tpu.matmul %325, %327, %cst_168 {dimension_numbers = #tpu.dot_dimension_numbers<[1], [0], [0], [1], [0, 0, 1, 1], [], []>} : vector<8x32xf32>, vector<32x32xf32>, vector<8x32xf32> -> vector<8x32xf32>
    %333 = vector.broadcast %328 : vector<1x32xf32> to vector<8x32xf32>
    %334 = arith.addf %332, %333 : vector<8x32xf32>
    %cst_169 = arith.constant 0.000000e+00 : f32
    %335 = vector.broadcast %cst_169 : f32 to vector<8x32xf32>
    %336 = arith.maximumf %334, %335 : vector<8x32xf32>
    %cst_170 = arith.constant dense<0.000000e+00> : vector<8x32xf32>
    %337 = tpu.matmul %336, %330, %cst_170 {dimension_numbers = #tpu.dot_dimension_numbers<[1], [0], [0], [1], [0, 0, 1, 1], [], []>} : vector<8x32xf32>, vector<32x32xf32>, vector<8x32xf32> -> vector<8x32xf32>
    %338 = vector.broadcast %331 : vector<1x32xf32> to vector<8x32xf32>
    %339 = arith.addf %337, %338 : vector<8x32xf32>
    %340 = arith.addf %325, %339 : vector<8x32xf32>
    %c20_171 = arith.constant 20 : index
    %c0_172 = arith.constant 0 : index
    %341 = vector.load %arg7[%c20_171, %c0_172] : memref<24x32xf32, #tpu.memory_space<vmem>>, vector<1x32xf32>
    %c21_173 = arith.constant 21 : index
    %c0_174 = arith.constant 0 : index
    %342 = vector.load %arg7[%c21_173, %c0_174] : memref<24x32xf32, #tpu.memory_space<vmem>>, vector<1x32xf32>
    %cst_175 = arith.constant dense<0.000000e+00> : vector<8xf32>
    %343 = vector.multi_reduction <add>, %340, %cst_175 [1] : vector<8x32xf32> to vector<8xf32>
    %344 = vector.shape_cast %343 : vector<8xf32> to vector<8x1xf32>
    %cst_176 = arith.constant 3.200000e+01 : f32
    %345 = vector.broadcast %cst_176 : f32 to vector<8x1xf32>
    %346 = arith.divf %344, %345 : vector<8x1xf32>
    %347 = vector.broadcast %346 : vector<8x1xf32> to vector<8x32xf32>
    %348 = arith.subf %340, %347 : vector<8x32xf32>
    %349 = arith.mulf %348, %348 : vector<8x32xf32>
    %cst_177 = arith.constant dense<0.000000e+00> : vector<8xf32>
    %350 = vector.multi_reduction <add>, %349, %cst_177 [1] : vector<8x32xf32> to vector<8xf32>
    %351 = vector.shape_cast %350 : vector<8xf32> to vector<8x1xf32>
    %cst_178 = arith.constant 3.200000e+01 : f32
    %352 = vector.broadcast %cst_178 : f32 to vector<8x1xf32>
    %353 = arith.divf %351, %352 : vector<8x1xf32>
    %354 = vector.broadcast %346 : vector<8x1xf32> to vector<8x32xf32>
    %355 = arith.subf %340, %354 : vector<8x32xf32>
    %cst_179 = arith.constant 9.99999974E-6 : f32
    %356 = vector.broadcast %cst_179 : f32 to vector<8x1xf32>
    %357 = arith.addf %353, %356 : vector<8x1xf32>
    %358 = math.rsqrt %357 : vector<8x1xf32>
    %359 = vector.broadcast %358 : vector<8x1xf32> to vector<8x32xf32>
    %360 = arith.mulf %355, %359 : vector<8x32xf32>
    %361 = vector.broadcast %341 : vector<1x32xf32> to vector<8x32xf32>
    %362 = arith.mulf %360, %361 : vector<8x32xf32>
    %363 = vector.broadcast %342 : vector<1x32xf32> to vector<8x32xf32>
    %364 = arith.addf %362, %363 : vector<8x32xf32>
    %c22_180 = arith.constant 22 : index
    %c0_181 = arith.constant 0 : index
    %365 = vector.load %arg7[%c22_180, %c0_181] : memref<24x32xf32, #tpu.memory_space<vmem>>, vector<1x32xf32>
    %cst_182 = arith.constant dense<0.000000e+00> : vector<1x8xf32>
    %366 = tpu.matmul %365, %364, %cst_182 {dimension_numbers = #tpu.dot_dimension_numbers<[1], [1], [0], [0], [0, 0, 1, 0], [], []>} : vector<1x32xf32>, vector<8x32xf32>, vector<1x8xf32> -> vector<1x8xf32>
    %c23 = arith.constant 23 : index
    %c0_183 = arith.constant 0 : index
    %367 = vector.load %arg7[%c23, %c0_183] : memref<24x32xf32, #tpu.memory_space<vmem>>, vector<1x32xf32>
    %368 = vector.extract_strided_slice %367 {offsets = [0, 0], sizes = [1, 1], strides = [1, 1]} : vector<1x32xf32> to vector<1x1xf32>
    %369 = vector.broadcast %368 : vector<1x1xf32> to vector<1x8xf32>
    %370 = arith.addf %366, %369 : vector<1x8xf32>
    %c0_184 = arith.constant 0 : index
    %c0_185 = arith.constant 0 : index
    %371 = vector.load %arg8[%c0_184, %c0_185] : memref<1x8xf32, #tpu.memory_space<vmem>>, vector<1x8xf32>
    tpu.vector_store %arg8[%c0_184, %c0_185], %370 {strides = array<i32>} : memref<1x8xf32, #tpu.memory_space<vmem>>, vector<1x8xf32>,
    return
  }
  func.func @transform_0(%arg0: i32) -> (i32, i32) {
    %c0_i32 = arith.constant 0 : i32
    %c0_i32_0 = arith.constant 0 : i32
    %c0_i32_1 = arith.constant 0 : i32
    return %c0_i32, %c0_i32_0 : i32, i32
  }
  func.func @transform_1(%arg0: i32) -> (i32, i32) {
    %c0_i32 = arith.constant 0 : i32
    %c0_i32_0 = arith.constant 0 : i32
    %c0_i32_1 = arith.constant 0 : i32
    return %c0_i32, %c0_i32_0 : i32, i32
  }
  func.func @transform_2(%arg0: i32) -> (i32, i32) {
    %c0_i32 = arith.constant 0 : i32
    %c0_i32_0 = arith.constant 0 : i32
    %c0_i32_1 = arith.constant 0 : i32
    return %c0_i32, %c0_i32_0 : i32, i32
  }
  func.func @transform_3(%arg0: i32) -> (i32, i32) {
    %c0_i32 = arith.constant 0 : i32
    %c0_i32_0 = arith.constant 0 : i32
    %c0_i32_1 = arith.constant 0 : i32
    return %c0_i32, %c0_i32_0 : i32, i32
  }
  func.func @transform_4(%arg0: i32) -> (i32, i32) {
    %c0_i32 = arith.constant 0 : i32
    %c0_i32_0 = arith.constant 0 : i32
    %c0_i32_1 = arith.constant 0 : i32
    return %c0_i32, %c0_i32_0 : i32, i32
  }
  func.func @transform_5(%arg0: i32) -> (i32, i32, i32) {
    %c0_i32 = arith.constant 0 : i32
    %c0_i32_0 = arith.constant 0 : i32
    %c0_i32_1 = arith.constant 0 : i32
    %c0_i32_2 = arith.constant 0 : i32
    return %c0_i32, %c0_i32_0, %c0_i32_1 : i32, i32, i32
  }
  func.func @transform_6(%arg0: i32) -> (i32, i32) {
    %c0_i32 = arith.constant 0 : i32
    %c0_i32_0 = arith.constant 0 : i32
    %c0_i32_1 = arith.constant 0 : i32
    return %c0_i32, %c0_i32_0 : i32, i32
  }
  func.func @transform_7(%arg0: i32) -> (i32, i32) {
    %c0_i32 = arith.constant 0 : i32
    %c0_i32_0 = arith.constant 0 : i32
    %c0_i32_1 = arith.constant 0 : i32
    return %c0_i32, %c0_i32_0 : i32, i32
  }
}

</mosaic_0001>

<bundles_post_ra>
// kernel: tpu_custom_call.1
= control target key start
LH: loop header
LB: loop body
LE: loop exit
PB: predicated region body
PF: predicated region fallthrough
CT: control target
= control target key end

     0   :  { %12 = vsyncpa [#allocation3], 0  ;;  %s4269_s0 = inlined_call_operand.hbm [shape: f32[8,32], index: 0, kind: input, shape index: {}]   ;;  %s4270_s1 = inlined_call_operand.vmem [shape: f32[2,32], index: 1, kind: input, shape index: {}]   ;;  %s4271_s2 = inlined_call_operand.hbm [shape: f32[8,8], index: 2, kind: input, shape index: {}]   ;;  %s4272_s3 = inlined_call_operand.vmem [shape: f32[2,8], index: 3, kind: input, shape index: {}]   ;;  %s4273_s4 = inlined_call_operand.vmem [shape: f32[8,6], index: 4, kind: input, shape index: {}]   ;;  %s4274_s5 = inlined_call_operand.hbm [shape: f32[23,32,32], index: 5, kind: input, shape index: {}]   ;;  %s4275_s6 = inlined_call_operand.hbm [shape: f32[24,32], index: 6, kind: input, shape index: {}]   ;;  %s4276_s7 = inlined_call_operand.hbm [shape: f32[1,8], index: 7, kind: output, shape index: {}]  }
   0x1   :  { %13 = vsyncpa [#allocation6], 0 }
   0x2   :  { %14 = vsyncpa [#allocation9], 0 }
   0x3   :  { %15 = vsyncpa [#allocation4], 0  ;;  %s3923_s24 = smov [#allocation5]   ;;  %s3924_s26 = smov [#allocation2]  }
   0x4   :  { %s34_s25 = sshll.u32 %s3923_s24, 4  ;;  %s22_s27 = sshll.u32 %s3924_s26, 4  ;;  %s35_s25 = int_to_ptr.vmem [resolvable:$true] %s34_s25  ;;  %s23_s27 = int_to_ptr.vmem [resolvable:$true] %s22_s27 }
   0x5   :  { %s3805_s30 = scalar_lea.hbm %s4271_s2, 128 }
   0x6   :  { %p3806_p0 = scmp.ne.s32.totalorder %s4271_s2, %s3805_s30  ;;  %p3809_p1 = scmp.lt.u32.totalorder %s3805_s30, %s4271_s2 }
   0x8   :  { %p3811_p2 = pnand %p3809_p1, %p3806_p0 }
   0xa   :  { %3814 = shalt.err (!%p3811_p2)
}
   0xb   :  { %s3815_s12 = scalar_lea.vmem %s35_s25, 128  ;;  %p3820_p4 = scmp.lt.s32.totalorder %s35_s25, %s35_s25 }
   0xc   :  { %p3816_p3 = scmp.ne.s32.totalorder %s35_s25, %s3815_s12  ;;  %p3821_p5 = scmp.lt.s32.totalorder %s3815_s12, %s3815_s12 }
   0xe   :  { %p3822_p6 = por %p3821_p5, %p3820_p4 }
  0x10   :  { %p3823_p7 = pnand %p3822_p6, %p3816_p3 }
  0x12   :  { %3826 = shalt.err (!%p3823_p7)
}
  0x13   :  { %37 = dma.hbm_to_vmem [thread:$0]  %s4271_s2, 128, %s35_s25, [#allocation6]  }
  0x14   :  { %s3827_s17 = scalar_lea.hbm %s4269_s0, 128 }
  0x15   :  { %p3828_p8 = scmp.ne.s32.totalorder %s4269_s0, %s3827_s17  ;;  %p3831_p9 = scmp.lt.u32.totalorder %s3827_s17, %s4269_s0 }
  0x17   :  { %p3833_p10 = pnand %p3831_p9, %p3828_p8 }
  0x19   :  { %3836 = shalt.err (!%p3833_p10)
}
  0x1a   :  { %s3837_s22 = scalar_lea.vmem %s23_s27, 128  ;;  %p3842_p12 = scmp.lt.s32.totalorder %s23_s27, %s23_s27 }
  0x1b   :  { %p3838_p11 = scmp.ne.s32.totalorder %s23_s27, %s3837_s22  ;;  %p3843_p13 = scmp.lt.s32.totalorder %s3837_s22, %s3837_s22 }
  0x1d   :  { %p3844_p0 = por %p3843_p13, %p3842_p12 }
  0x1f   :  { %p3845_p1 = pnand %p3844_p0, %p3838_p11 }
  0x21   :  { %3848 = shalt.err (!%p3845_p1)
}
  0x22   :  { %25 = dma.hbm_to_vmem [thread:$0]  %s4269_s0, 128, %s23_s27, [#allocation3]  }
  0x23   :  { %s3925_s24 = smov [#allocation7]   ;;  %s3849_s29 = scalar_lea.hbm %s4274_s5, 11776 }
  0x24   :  { %s47_s25 = sshll.u32 %s3925_s24, 4  ;;  %p3850_p2 = scmp.ne.s32.totalorder %s4274_s5, %s3849_s29  ;;  %s48_s25 = int_to_ptr.vmem [resolvable:$true] %s47_s25 }
  0x25   :  { %p3853_p3 = scmp.lt.u32.totalorder %s3849_s29, %s4274_s5 }
  0x27   :  { %p3855_p4 = pnand %p3853_p3, %p3850_p2 }
  0x29   :  { %3858 = shalt.err (!%p3855_p4)
}
  0x2a   :  { %s3859_s11 = scalar_lea.vmem %s48_s25, 11776  ;;  %p3864_p6 = scmp.lt.s32.totalorder %s48_s25, %s48_s25 }
  0x2b   :  { %p3860_p5 = scmp.ne.s32.totalorder %s48_s25, %s3859_s11  ;;  %p3865_p7 = scmp.lt.s32.totalorder %s3859_s11, %s3859_s11 }
  0x2d   :  { %p3866_p8 = por %p3865_p7, %p3864_p6 }
  0x2f   :  { %p3867_p9 = pnand %p3866_p8, %p3860_p5 }
  0x31   :  { %3870 = shalt.err (!%p3867_p9)
}
  0x32   :  { %s3926_s0 = smov 128   ;;  %s3927_s27 = smov 8  }
  0x33   :  { %53 = dma.hbm_to_vmem [thread:$0]  %s4274_s5, 11776, %s48_s25, [#allocation6], %s3926_s0, %s3926_s0, %s3927_s27  }
  0x34   :  { %s3928_s14 = smov [#allocation8]   ;;  %s3871_s18 = scalar_lea.hbm %s4275_s6, 384 }
  0x35   :  { %s59_s15 = sshll.u32 %s3928_s14, 4  ;;  %p3872_p10 = scmp.ne.s32.totalorder %s4275_s6, %s3871_s18  ;;  %s60_s15 = int_to_ptr.vmem [resolvable:$true] %s59_s15 }
  0x36   :  { %p3875_p11 = scmp.lt.u32.totalorder %s3871_s18, %s4275_s6 }
  0x38   :  { %p3877_p12 = pnand %p3875_p11, %p3872_p10 }
  0x3a   :  { %3880 = shalt.err (!%p3877_p12)
}
  0x3b   :  { %s3881_s2 = scalar_lea.vmem %s60_s15, 384  ;;  %p3886_p0 = scmp.lt.s32.totalorder %s60_s15, %s60_s15 }
  0x3c   :  { %p3882_p13 = scmp.ne.s32.totalorder %s60_s15, %s3881_s2  ;;  %p3887_p1 = scmp.lt.s32.totalorder %s3881_s2, %s3881_s2 }
  0x3e   :  { %p3888_p2 = por %p3887_p1, %p3886_p0 }
  0x40   :  { %p3889_p3 = pnand %p3888_p2, %p3882_p13 }
  0x42   :  { %3892 = shalt.err (!%p3889_p3)
}
  0x43   :  { %65 = dma.hbm_to_vmem [thread:$0]  %s4275_s6, 384, %s60_s15, [#allocation9], %s3926_s0, %s3926_s0, %s3927_s27  }
  0x44   :  { %3915 = dma.done.wait [#allocation3], 128  }
  0x45   :  { %3916 = vsyncadd [#allocation3], 4294967168 }
  0x46   :  { %3917 = dma.done.wait [#allocation6], 11904  }
  0x47   :  { %3918 = vsyncadd [#allocation6], 4294955392 }
  0x48   :  { %3919 = dma.done.wait [#allocation9], 384  }
  0x49   :  { %3920 = vsyncadd [#allocation9], 4294966912  ;;  %v3929_v0 = vmov 0.0|0.0   ;;  %vm3930_vm0 = vmmov 0   ;;  %v3931_v1 = vmov 0.0   ;;  %v79_v2 = vld [vmem:[#allocation7] sm:$0xff] }
  0x4a   :  { %3623 = vmatprep.subr.bf16.mxu0 %v3929_v0  ;;  %3324 = vmatprep.mubr.msk.f32.mxu0 %vm3930_vm0, %v3931_v1  ;;  %v80_v3 = vld [vmem:[#allocation7 + $0x8] sm:$0xff]  ;;  %v81_v4 = vld [vmem:[#allocation7 + $0x10] sm:$0xff]  ;;  %v82_v6 = vld [vmem:[#allocation7 + $0x18] sm:$0xff]  ;;  %vm94_vm1 = vcmask 261120   ;;  %vm475_vm2 = vcmask 130048   ;;  %s3932_s6 = smov 112  }
  0x4b   :  { %3629 = vmatprep.subr.bf16.mxu1 %v3929_v0  ;;  %3335 = vmatprep.mubr.msk.f32.mxu1 %vm3930_vm0, %v3931_v1  ;;  %v3624_v5 = vpack.c.bf16 %v80_v3, %v79_v2  ;;  %v85_v7 = vld [vmem:[#allocation7 + $0x20] sm:$0xff]  ;;  %v86_v8 = vld [vmem:[#allocation7 + $0x28] sm:$0xff]  ;;  %v3627_v9 = vpack.c.bf16 %v82_v6, %v81_v4  ;;  %v78_v11 = vld [vmem:[#allocation2] sm:$0xff]  ;;  %vm552_vm3 = vcmask 64512   ;;  %s3933_s24 = smov 16   ;;  %vm1582_vm4 = vcmask 58368  }
  0x4c   :  { %v3630_v10 = vpack.c.bf16 %v86_v8, %v85_v7  ;;  %v87_v12 = vld [vmem:[#allocation7 + $0x30] sm:$0xff]  ;;  %v88_v13 = vld [vmem:[#allocation7 + $0x38] sm:$0xff]  ;;  %v248_v15 = vld [vmem:[#allocation7 + $0x40] sm:$0xff]  ;;  %vm1919_vm5 = vcmask 254976   ;;  %vm2141_vm6 = vcmask 1043456   ;;  %vm2145_vm7 = vcmask 1041408  }
  0x4d   :  { %3625 = vmatpush3.bf16.msra.mxu0 %v3624_v5  ;;  %v3633_v14 = vpack.c.bf16 %v88_v13, %v87_v12  ;;  %v249_v16 = vld [vmem:[#allocation7 + $0x48] sm:$0xff]  ;;  %v250_v18 = vld [vmem:[#allocation7 + $0x50] sm:$0xff]  ;;  %v251_v19 = vld [vmem:[#allocation7 + $0x58] sm:$0xff]  ;;  %vm2470_vm8 = vcmask 1045504   ;;  %vm2455_vm9 = vcmask 48128   ;;  %vm3095_vm10 = vcmask 57344  }
  0x4e   :  { %3626 = vmatprep.subr.bf16.mxu0 %v3929_v0  ;;  %3631 = vmatpush3.bf16.msra.mxu1 %v3630_v10  ;;  %v3636_v17 = vpack.c.bf16 %v249_v16, %v248_v15  ;;  %v3639_v20 = vpack.c.bf16 %v251_v19, %v250_v18  ;;  %v3114_v21 = vld [vmem:[#allocation8] ss:$0 sm:$0xff]  ;;  %v327_v23 = vld [vmem:[#allocation7 + $0x68] sm:$0xff]  ;;  %v328_v29 = vld [vmem:[#allocation7 + $0x70] sm:$0xff] }
  0x4f   :  { %3632 = vmatprep.subr.bf16.mxu1 %v3929_v0  ;;  %v326_v22 = vld [vmem:[#allocation7 + $0x60] sm:$0xff]  ;;  %v329_v30 = vld [vmem:[#allocation7 + $0x78] sm:$0xff]  ;;  %v402_v33 = vld [vmem:[#allocation7 + $0x88] sm:$0xff] }
  0x50   :  { %v3642_v27 = vpack.c.bf16 %v327_v23, %v326_v22  ;;  %v3645_v31 = vpack.c.bf16 %v329_v30, %v328_v29  ;;  %v401_v32 = vld [vmem:[#allocation7 + $0x80] sm:$0xff]  ;;  %v403_v39 = vld [vmem:[#allocation7 + $0x90] sm:$0xff]  ;;  %v404_v40 = vld [vmem:[#allocation7 + $0x98] sm:$0xff] }
  0x51   :  { %3628 = vmatpush3.bf16.msra.mxu0 %v3627_v9  ;;  %v3116_v34 = vld [vmem:[#allocation8 + $0x1] ss:$0 sm:$0xff]  ;;  %v3648_v36 = vpack.c.bf16 %v402_v33, %v401_v32  ;;  %v3651_v41 = vpack.c.bf16 %v404_v40, %v403_v39  ;;  %v246_v50 = vld [vmem:[#allocation5] sm:$0xff]  ;;  %v810_v15 = vld [vmem:[#allocation7 + $0xa8] sm:$0xff] }
  0x52   :  { %3635 = vmatprep.subr.bf16.mxu0 %v3929_v0  ;;  %3634 = vmatpush3.bf16.msra.mxu1 %v3633_v14  ;;  %v809_v14 = vld [vmem:[#allocation7 + $0xa0] sm:$0xff]  ;;  %v811_v16 = vld [vmem:[#allocation7 + $0xb0] sm:$0xff]  ;;  %v812_v18 = vld [vmem:[#allocation7 + $0xb8] sm:$0xff] }
  0x53   :  { %3641 = vmatprep.subr.bf16.mxu1 %v3929_v0  ;;  %v3657_v19 = vpack.c.bf16 %v812_v18, %v811_v16  ;;  %v916_v39 = vld [vmem:[#allocation7 + $0xd0] sm:$0xff]  ;;  %v917_v40 = vld [vmem:[#allocation7 + $0xd8] sm:$0xff] }
  0x54   :  { %3325 = vmatmul.mubr.msk.f32.vlgmr.msra.gmra.mrb[0].mxu0 %vm94_vm1, %v78_v11 }
  0x55   :  { %3346 = vmatprep.mubr.msk.f32.mxu0 %vm3930_vm0, %v3931_v1  ;;  %3637 = vmatpush3.bf16.msra.mxu0 %v3636_v17  ;;  %v3654_v17 = vpack.c.bf16 %v810_v15, %v809_v14 }
  0x56   :  { %3638 = vmatprep.subr.bf16.mxu0 %v3929_v0 }
  0x59   :  { %3640 = vmatpush3.bf16.msra.mxu0 %v3639_v20 }
  0x5a   :  { %3647 = vmatprep.subr.bf16.mxu0 %v3929_v0 }
 0x127   :  { %v164_v24 = vpop.f32.mrb[0].mxu0 }
 0x128   :  { %v165_v25 = vadd.f32 %v3114_v21, %v164_v24  ;;  %v3326_v26 = vpop.f32.mrb[1].mxu0 }
 0x12a   :  { %v168_v28 = vmax.f32 %v165_v25, 0.0 }
 0x12c   :  { %3336 = vmatmul.mubr.msk.f32.vlgmr.msra.gmra.mrb[0].mxu1 %vm94_vm1, %v168_v28 }
 0x12d   :  { %3643 = vmatpush3.bf16.msra.mxu1 %v3642_v27  ;;  %3357 = vmatprep.mubr.msk.f32.mxu1 %vm3930_vm0, %v3931_v1 }
 0x12e   :  { %3644 = vmatprep.subr.bf16.mxu1 %v3929_v0 }
 0x131   :  { %3646 = vmatpush3.bf16.msra.mxu1 %v3645_v31 }
 0x132   :  { %3371 = vmatprep.subr.mxu1 %v3931_v1 }
 0x1ff   :  { %v242_v35 = vpop.f32.mrb[0].mxu1 }
 0x200   :  { %v4044_v37 = vadd.f32 %v3116_v34, %v242_v35  ;;  %v3337_v38 = vpop.f32.mrb[1].mxu1  ;;  %v914_v35 = vld [vmem:[#allocation7 + $0xc0] sm:$0xff] }
 0x202   :  { %3347 = vmatmul.mubr.msk.f32.vlgmr.msra.gmra.mrb[2].mxu0 %vm94_vm1, %v4044_v37  ;;  %3358 = vmatmul.mubr.msk.f32.vlgmr.msra.gmra.mrb[2].mxu1 %vm94_vm1, %v4044_v37 }
 0x203   :  { %3649 = vmatpush3.bf16.msra.mxu0 %v3648_v36  ;;  %3368 = vmatprep.mubr.msk.f32.mxu0 %vm3930_vm0, %v3931_v1  ;;  %v915_v36 = vld [vmem:[#allocation7 + $0xc8] sm:$0xff] }
 0x204   :  { %3650 = vmatprep.subr.bf16.mxu0 %v3929_v0  ;;  %3373 = vmatprep.mubr.msk.f32.mxu1 %vm3930_vm0, %v3931_v1  ;;  %v3660_v38 = vpack.c.bf16 %v915_v36, %v914_v35  ;;  %v1354_v36 = vld [vmem:[#allocation7 + $0x160] sm:$0xff] }
 0x207   :  { %3652 = vmatpush3.bf16.msra.mxu0 %v3651_v41  ;;  %v920_v41 = vld [vmem:[#allocation7 + $0xe0] sm:$0xff] }
 0x208   :  { %3381 = vmatprep.subr.mxu0 %v3931_v1 }
 0x20a   :  { %3369 = vmatmul.mubr.msk.f32.vlgmr.msra.gmra.mrb[4].mxu0 %vm94_vm1, %v4044_v37 }
 0x20b   :  { %3383 = vmatprep.mubr.msk.f32.mxu0 %vm3930_vm0, %v3931_v1 }
 0x2d5   :  { %v321_v42 = vpop.f32.mrb[2].mxu0  ;;  %v396_v43 = vpop.f32.mrb[2].mxu1 }
 0x2d6   :  { %639 = vrot.lane.b32.xlu0 %v396_v43, %s3932_s6  ;;  %v3348_v44 = vpop.f32.mrb[3].mxu0  ;;  %v3359_v45 = vpop.f32.mrb[3].mxu1  ;;  %3372 = vmatpush3.xpose.msk.msra.mxu1 %vm475_vm2, %v396_v43 }
 0x2d7   :  { %3376 = vmatprep.subr.mxu1 %v3931_v1 }
 0x2d9   :  { %3374 = vmatmul.mubr.msk.f32.vlgmr.msra.gmra.mrb[4].mxu1 %vm475_vm2, %v321_v42 }
 0x2da   :  { %637 = vrot.lane.b32.xlu0 %v321_v42, %s3932_s6  ;;  %3378 = vmatprep.mubr.msk.f32.mxu1 %vm3930_vm0, %v3931_v1  ;;  %v921_v42 = vld [vmem:[#allocation7 + $0xe8] sm:$0xff] }
 0x2db   :  { %v3666_v43 = vpack.c.bf16 %v921_v42, %v920_v41  ;;  %v1433_v41 = vld [vmem:[#allocation7 + $0x188] sm:$0xff] }
 0x2dd   :  { %v471_v46 = vpop.f32.mrb[4].mxu0 }
 0x2de   :  { %v3370_v47 = vpop.f32.mrb[5].mxu0  ;;  %3377 = vmatpush3.msra.mxu1 %v471_v46 }
 0x2df   :  { %3386 = vmatprep.subr.mxu1 %v3931_v1 }
 0x348   :  { %v640_v48 = vpop.permute.xlu0 %639 }
 0x349   :  { %3382 = vmatpush3.xpose.msk.msra.mxu0 %vm475_vm2, %v640_v48  ;;  %v3128_v48 = vld [vmem:[#allocation8 + $0x2] ss:$0 sm:$0xff] }
 0x34a   :  { %3653 = vmatprep.subr.bf16.mxu0 %v3929_v0 }
 0x34c   :  { %v638_v49 = vpop.permute.xlu0 %637 }
 0x34d   :  { %3384 = vmatmul.mubr.msk.f32.vlgmr.msra.gmra.mrb[6].mxu0 %vm475_vm2, %v638_v49 }
 0x34e   :  { %3399 = vmatprep.mubr.msk.f32.mxu0 %vm3930_vm0, %v3931_v1  ;;  %3655 = vmatpush3.bf16.msra.mxu0 %v3654_v17  ;;  %v3132_v17 = vld [vmem:[#allocation8 + $0x5] ss:$0 sm:$0xff] }
 0x34f   :  { %3656 = vmatprep.subr.bf16.mxu0 %v3929_v0 }
 0x352   :  { %3658 = vmatpush3.bf16.msra.mxu0 %v3657_v19 }
 0x353   :  { %3665 = vmatprep.subr.bf16.mxu0 %v3929_v0 }
 0x3ac   :  { %v548_v51 = vpop.f32.mrb[4].mxu1 }
 0x3ad   :  { %v549_v52 = vadd.f32 %v548_v51, %v246_v50  ;;  %v3375_v53 = vpop.f32.mrb[5].mxu1 }
 0x3ae   :  { %v922_v53 = vld [vmem:[#allocation7 + $0xf0] sm:$0xff] }
 0x3af   :  { %v553_v54 = vsel %vm552_vm3, %v549_v52, -inf }
 0x3b0   :  { %554 = vmax.xlane.f32.xlu1 %v553_v54  ;;  %v923_v54 = vld [vmem:[#allocation7 + $0xf8] sm:$0xff] }
 0x420   :  { %v711_v55 = vpop.f32.mrb[6].mxu0 }
 0x421   :  { %v712_v56 = vadd.f32 %v711_v55, %v246_v50  ;;  %v3385_v57 = vpop.f32.mrb[7].mxu0  ;;  %v3129_v50 = vld [vmem:[#allocation8 + $0x3] ss:$0 sm:$0xff]  ;;  %v3669_v55 = vpack.c.bf16 %v923_v54, %v922_v53  ;;  %v3134_v54 = vld [vmem:[#allocation8 + $0x6] ss:$0 sm:$0xff] }
 0x422   :  { %v1109_v57 = vld [vmem:[#allocation7 + $0x108] sm:$0xff] }
 0x423   :  { %v715_v58 = vsel %vm552_vm3, %v712_v56, -inf }
 0x424   :  { %716 = vmax.xlane.f32.xlu1 %v715_v58  ;;  %v1110_v58 = vld [vmem:[#allocation7 + $0x110] sm:$0xff] }
 0x43d   :  { %v555_v59 = vpop.xlane.xlu1 %554 }
 0x43e   :  { %v556_v60 = vsub.f32 %v549_v52, %v555_v59 }
 0x440   :  { %v557_v61 = vmul.f32 1.442695, %v556_v60  ;;  %v1111_v60 = vld [vmem:[#allocation7 + $0x118] sm:$0xff] }
 0x442   :  { %3769 = vpow2.f32 %v557_v61  ;;  %v3675_v61 = vpack.c.bf16 %v1111_v60, %v1110_v58 }
 0x44c   :  { %v3770_v62 = vpop.eup %3769 }
 0x44d   :  { %v559_v63 = vsel %vm552_vm3, %v3770_v62, 0.0 }
 0x44e   :  { %560 = vadd.xlane.f32.xlu0 %v559_v63  ;;  %v3130_v63 = vld [vmem:[#allocation8 + $0x4] ss:$0 sm:$0xff] }
 0x4b1   :  { %v717_v2 = vpop.xlane.xlu1 %716 }
 0x4b2   :  { %v718_v3 = vsub.f32 %v712_v56, %v717_v2  ;;  %v1108_v56 = vld [vmem:[#allocation7 + $0x100] sm:$0xff] }
 0x4b3   :  { %v3672_v59 = vpack.c.bf16 %v1109_v57, %v1108_v56  ;;  %v3135_v56 = vld [vmem:[#allocation8 + $0x7] ss:$0 sm:$0xff] }
 0x4b4   :  { %v719_v4 = vmul.f32 1.442695, %v718_v3 }
 0x4b6   :  { %3771 = vpow2.f32 %v719_v4 }
 0x4c0   :  { %v3772_v5 = vpop.eup %3771 }
 0x4c1   :  { %v721_v6 = vsel %vm552_vm3, %v3772_v5, 0.0 }
 0x4c2   :  { %722 = vadd.xlane.f32.xlu1 %v721_v6  ;;  %v1114_v6 = vld [vmem:[#allocation7 + $0x120] sm:$0xff] }
 0x4d3   :  { %727 = vrot.lane.b32.xlu1 %v471_v46, %s3932_s6 }
 0x4db   :  { %v561_v7 = vpop.xlane.xlu0 %560 }
 0x4dc   :  { %3773 = vrcp.f32 %v561_v7  ;;  %v1115_v7 = vld [vmem:[#allocation7 + $0x128] sm:$0xff] }
 0x4e6   :  { %v3774_v8 = vpop.eup %3773 }
 0x4e7   :  { %v563_v9 = vmul.f32 %v3774_v8, %v3770_v62  ;;  %v1106_v62 = vld [vmem:[%s4270_s1] sm:$0x3]  ;;  %v3678_v8 = vpack.c.bf16 %v1115_v7, %v1114_v6 }
 0x4e9   :  { %3379 = vmatmul.mubr.msk.f32.vlgmr.msra.gmra.mrb[6].mxu1 %vm552_vm3, %v563_v9  ;;  %v1116_v9 = vld [vmem:[#allocation7 + $0x130] sm:$0xff] }
 0x4ea   :  { %3388 = vmatprep.mubr.msk.f32.mxu1 %vm3930_vm0, %v3931_v1 }
 0x54f   :  { %v723_v10 = vpop.xlane.xlu1 %722 }
 0x550   :  { %3775 = vrcp.f32 %v723_v10  ;;  %v1117_v10 = vld [vmem:[#allocation7 + $0x138] sm:$0xff] }
 0x553   :  { %v728_v11 = vpop.permute.xlu1 %727 }
 0x554   :  { %3387 = vmatpush3.msra.mxu1 %v728_v11  ;;  %v3136_v11 = vld [vmem:[#allocation8 + $0x8] ss:$0 sm:$0xff] }
 0x555   :  { %3659 = vmatprep.subr.bf16.mxu1 %v3929_v0 }
 0x55a   :  { %v3776_v12 = vpop.eup %3775 }
 0x55b   :  { %v725_v13 = vmul.f32 %v3776_v12, %v3772_v5  ;;  %v3681_v12 = vpack.c.bf16 %v1117_v10, %v1116_v9 }
 0x55d   :  { %3389 = vmatmul.mubr.msk.f32.vlgmr.msra.gmra.mrb[8].mxu1 %vm552_vm3, %v725_v13 }
 0x55e   :  { %3410 = vmatprep.mubr.msk.f32.mxu1 %vm3930_vm0, %v3931_v1  ;;  %3661 = vmatpush3.bf16.msra.mxu1 %v3660_v38  ;;  %v1355_v38 = vld [vmem:[#allocation7 + $0x168] sm:$0xff] }
 0x55f   :  { %3662 = vmatprep.subr.bf16.mxu1 %v3929_v0 }
 0x5bc   :  { %v633_v20 = vpop.f32.mrb[6].mxu1 }
 0x5bd   :  { %v3380_v21 = vpop.f32.mrb[7].mxu1 }
 0x630   :  { %v799_v22 = vpop.f32.mrb[8].mxu1 }
 0x631   :  { %804 = vrot.lane.b32.xlu1 %v799_v22, %s3933_s24  ;;  %v3390_v23 = vpop.f32.mrb[9].mxu1 }
 0x6a3   :  { %v805_v24 = vpop.permute.xlu1 %804 }
 0x6a4   :  { %v807_v25 = vsel %vm475_vm2, %v633_v20, %v805_v24 }
 0x6a5   :  { %3400 = vmatmul.mubr.msk.f32.vlgmr.msra.gmra.mrb[8].mxu0 %vm94_vm1, %v807_v25 }
 0x6a6   :  { %3421 = vmatprep.mubr.msk.f32.mxu0 %vm3930_vm0, %v3931_v1  ;;  %3667 = vmatpush3.bf16.msra.mxu0 %v3666_v43 }
 0x6a7   :  { %3668 = vmatprep.subr.bf16.mxu0 %v3929_v0 }
 0x6aa   :  { %3670 = vmatpush3.bf16.msra.mxu0 %v3669_v55 }
 0x6ab   :  { %3677 = vmatprep.subr.bf16.mxu0 %v3929_v0 }
 0x778   :  { %v882_v26 = vpop.f32.mrb[8].mxu0 }
 0x779   :  { %v886_v27 = vadd.f32 %v882_v26, %v4044_v37  ;;  %v3401_v28 = vpop.f32.mrb[9].mxu0  ;;  %v3663_v37 = vpack.c.bf16 %v917_v40, %v916_v39  ;;  %v3690_v40 = vpack.c.bf16 %v1355_v38, %v1354_v36 }
 0x77a   :  { %v1276_v28 = vld [vmem:[#allocation7 + $0x140] sm:$0xff] }
 0x77b   :  { %v889_v29 = vsel %vm94_vm1, %v886_v27, 0.0  ;;  %3664 = vmatpush3.bf16.msra.mxu1 %v3663_v37  ;;  %v1432_v37 = vld [vmem:[#allocation7 + $0x180] sm:$0xff] }
 0x77c   :  { %890 = vadd.xlane.f32.xlu1 %v889_v29  ;;  %3671 = vmatprep.subr.bf16.mxu1 %v3929_v0  ;;  %v1277_v29 = vld [vmem:[#allocation7 + $0x148] sm:$0xff]  ;;  %v3696_v43 = vpack.c.bf16 %v1433_v41, %v1432_v37 }
 0x809   :  { %v891_v30 = vpop.xlane.xlu1 %890 }
 0x80a   :  { %v893_v31 = vmul.f32 0.03125, %v891_v30  ;;  %v3684_v30 = vpack.c.bf16 %v1277_v29, %v1276_v28 }
 0x80c   :  { %v894_v32 = vsub.f32 %v886_v27, %v893_v31  ;;  %v1278_v31 = vld [vmem:[#allocation7 + $0x150] sm:$0xff] }
 0x80e   :  { %v895_v33 = vmul.f32 %v894_v32, %v894_v32 }
 0x810   :  { %v896_v34 = vsel %vm94_vm1, %v895_v33, 0.0 }
 0x811   :  { %897 = vadd.xlane.f32.xlu0 %v896_v34  ;;  %v3138_v34 = vld [vmem:[#allocation8 + $0x9] ss:$0 sm:$0xff] }
 0x89e   :  { %v898_v44 = vpop.xlane.xlu0 %897 }
 0x89f   :  { %v899_v45 = vmul.f32 0.03125, %v898_v44  ;;  %v1356_v44 = vld [vmem:[#allocation7 + $0x170] sm:$0xff] }
 0x8a1   :  { %v900_v46 = vadd.f32 1e-05, %v899_v45  ;;  %v1357_v45 = vld [vmem:[#allocation7 + $0x178] sm:$0xff] }
 0x8a3   :  { %3777 = vrsqrt.f32 %v900_v46  ;;  %v1434_v46 = vld [vmem:[#allocation7 + $0x190] sm:$0xff] }
 0x8ad   :  { %v3778_v47 = vpop.eup %3777 }
 0x8ae   :  { %v902_v49 = vmul.f32 %v3778_v47, %v894_v32  ;;  %v1279_v32 = vld [vmem:[#allocation7 + $0x158] sm:$0xff]  ;;  %v3693_v47 = vpack.c.bf16 %v1357_v45, %v1356_v44 }
 0x8af   :  { %v3687_v33 = vpack.c.bf16 %v1279_v32, %v1278_v31  ;;  %v1839_v31 = vld [vmem:[#allocation7 + $0x1a0] sm:$0xff]  ;;  %v1840_v32 = vld [vmem:[#allocation7 + $0x1a8] sm:$0xff] }
 0x8b0   :  { %v907_v51 = vmul.f32 %v3128_v48, %v902_v49  ;;  %v1435_v48 = vld [vmem:[#allocation7 + $0x198] sm:$0xff] }
 0x8b1   :  { %v3699_v49 = vpack.c.bf16 %v1435_v48, %v1434_v46 }
 0x8b2   :  { %v912_v52 = vadd.f32 %v3129_v50, %v907_v51 }
 0x8b4   :  { %3411 = vmatmul.mubr.msk.f32.vlgmr.msra.gmra.mrb[10].mxu1 %vm94_vm1, %v912_v52 }
 0x8b5   :  { %3432 = vmatprep.mubr.msk.f32.mxu1 %vm3930_vm0, %v3931_v1  ;;  %3673 = vmatpush3.bf16.msra.mxu1 %v3672_v59 }
 0x8b6   :  { %3674 = vmatprep.subr.bf16.mxu1 %v3929_v0 }
 0x8b9   :  { %3676 = vmatpush3.bf16.msra.mxu1 %v3675_v61 }
 0x8ba   :  { %3683 = vmatprep.subr.bf16.mxu1 %v3929_v0 }
 0x8bc   :  { %3433 = vmatmul.mubr.msk.f32.vlgmr.msra.gmra.mrb[12].mxu1 %vm94_vm1, %v1106_v62 }
 0x8bd   :  { %3454 = vmatprep.mubr.msk.f32.mxu1 %vm3930_vm0, %v3931_v1  ;;  %3685 = vmatpush3.bf16.msra.mxu1 %v3684_v30 }
 0x8be   :  { %3686 = vmatprep.subr.bf16.mxu1 %v3929_v0 }
 0x8c1   :  { %3688 = vmatpush3.bf16.msra.mxu1 %v3687_v33  ;;  %v1841_v33 = vld [vmem:[#allocation7 + $0x1b0] sm:$0xff] }
 0x8c2   :  { %3695 = vmatprep.subr.bf16.mxu1 %v3929_v0 }
 0x987   :  { %v998_v2 = vpop.f32.mrb[10].mxu1 }
 0x988   :  { %v999_v3 = vadd.f32 %v3130_v63, %v998_v2  ;;  %v3412_v4 = vpop.f32.mrb[11].mxu1 }
 0x98a   :  { %v1002_v5 = vmax.f32 %v999_v3, 0.0 }
 0x98c   :  { %3422 = vmatmul.mubr.msk.f32.vlgmr.msra.gmra.mrb[10].mxu0 %vm94_vm1, %v1002_v5  ;;  %v1274_v5 = vld [vmem:[%s4272_s3] sm:$0x3] }
 0x98d   :  { %3443 = vmatprep.mubr.msk.f32.mxu0 %vm3930_vm0, %v3931_v1  ;;  %3679 = vmatpush3.bf16.msra.mxu0 %v3678_v8 }
 0x98e   :  { %3680 = vmatprep.subr.bf16.mxu0 %v3929_v0 }
 0x98f   :  { %v1192_v13 = vpop.f32.mrb[12].mxu1 }
 0x990   :  { %v1193_v14 = vadd.f32 %v3136_v11, %v1192_v13  ;;  %v3434_v15 = vpop.f32.mrb[13].mxu1 }
 0x991   :  { %3682 = vmatpush3.bf16.msra.mxu0 %v3681_v12 }
 0x992   :  { %v1196_v16 = vmax.f32 %v1193_v14, 0.0  ;;  %3689 = vmatprep.subr.bf16.mxu0 %v3929_v0 }
 0x994   :  { %3444 = vmatmul.mubr.msk.f32.vlgmr.msra.gmra.mrb[12].mxu0 %vm94_vm1, %v1196_v16 }
 0x995   :  { %3465 = vmatprep.mubr.msk.f32.mxu0 %vm3930_vm0, %v3931_v1  ;;  %3691 = vmatpush3.bf16.msra.mxu0 %v3690_v40 }
 0x996   :  { %3692 = vmatprep.subr.bf16.mxu0 %v3929_v0 }
 0x999   :  { %3694 = vmatpush3.bf16.msra.mxu0 %v3693_v47 }
 0x99a   :  { %3479 = vmatprep.subr.mxu0 %v3931_v1 }
 0xa5f   :  { %v1076_v18 = vpop.f32.mrb[10].mxu0 }
 0xa60   :  { %v1077_v19 = vadd.f32 %v3132_v17, %v1076_v18  ;;  %v3423_v20 = vpop.f32.mrb[11].mxu0 }
 0xa62   :  { %v1080_v21 = vadd.f32 %v1077_v19, %v912_v52 }
 0xa64   :  { %v1083_v22 = vsel %vm94_vm1, %v1080_v21, 0.0 }
 0xa65   :  { %1084 = vadd.xlane.f32.xlu0 %v1083_v22 }
 0xa67   :  { %v1270_v35 = vpop.f32.mrb[12].mxu0 }
 0xa68   :  { %v4122_v39 = vadd.f32 %v3138_v34, %v1270_v35  ;;  %v3445_v42 = vpop.f32.mrb[13].mxu0  ;;  %v3702_v34 = vpack.c.bf16 %v1840_v32, %v1839_v31  ;;  %v1842_v35 = vld [vmem:[#allocation7 + $0x1b8] sm:$0xff] }
 0xa69   :  { %v3705_v36 = vpack.c.bf16 %v1842_v35, %v1841_v33  ;;  %v2152_v31 = vld [vmem:[#allocation7 + $0x218] sm:$0xff]  ;;  %v2137_v33 = vld [vmem:[#allocation7 + $0x2c0] sm:$0xff] }
 0xa6a   :  { %3455 = vmatmul.mubr.msk.f32.vlgmr.msra.gmra.mrb[14].mxu1 %vm94_vm1, %v4122_v39  ;;  %v2227_v35 = vld [vmem:[#allocation7 + $0x220] sm:$0xff] }
 0xa6b   :  { %3697 = vmatpush3.bf16.msra.mxu1 %v3696_v43  ;;  %3476 = vmatprep.mubr.msk.f32.mxu1 %vm3930_vm0, %v3931_v1 }
 0xa6c   :  { %3698 = vmatprep.subr.bf16.mxu1 %v3929_v0 }
 0xa6f   :  { %3700 = vmatpush3.bf16.msra.mxu1 %v3699_v49 }
 0xa70   :  { %3484 = vmatprep.subr.mxu1 %v3931_v1 }
 0xaf2   :  { %v1085_v23 = vpop.xlane.xlu0 %1084 }
 0xaf3   :  { %v1086_v24 = vmul.f32 0.03125, %v1085_v23 }
 0xaf5   :  { %v1087_v25 = vsub.f32 %v1080_v21, %v1086_v24 }
 0xaf7   :  { %v1088_v26 = vmul.f32 %v1087_v25, %v1087_v25 }
 0xaf9   :  { %v1089_v27 = vsel %vm94_vm1, %v1088_v26, 0.0 }
 0xafa   :  { %1090 = vadd.xlane.f32.xlu0 %v1089_v27 }
 0xb3d   :  { %v1349_v59 = vpop.f32.mrb[14].mxu1 }
 0xb3e   :  { %v3456_v60 = vpop.f32.mrb[15].mxu1  ;;  %1667 = vrot.lane.b32.xlu1 %v1349_v59, %s3932_s6 }
 0xb87   :  { %v1091_v50 = vpop.xlane.xlu0 %1090 }
 0xb88   :  { %v1092_v51 = vmul.f32 0.03125, %v1091_v50 }
 0xb8a   :  { %v1093_v52 = vadd.f32 1e-05, %v1092_v51 }
 0xb8c   :  { %3779 = vrsqrt.f32 %v1093_v52 }
 0xb96   :  { %v3780_v53 = vpop.eup %3779 }
 0xb97   :  { %v1095_v55 = vmul.f32 %v3780_v53, %v1087_v25  ;;  %v1944_v53 = vld [vmem:[#allocation7 + $0x1c0] sm:$0xff] }
 0xb99   :  { %v1100_v57 = vmul.f32 %v3134_v54, %v1095_v55  ;;  %v1945_v54 = vld [vmem:[#allocation7 + $0x1c8] sm:$0xff] }
 0xb9a   :  { %v3708_v55 = vpack.c.bf16 %v1945_v54, %v1944_v53  ;;  %v3156_v53 = vld [vmem:[#allocation8 + $0xe] ss:$0 sm:$0xff] }
 0xb9b   :  { %v1105_v58 = vadd.f32 %v3135_v56, %v1100_v57  ;;  %v1946_v56 = vld [vmem:[#allocation7 + $0x1d0] sm:$0xff]  ;;  %v1947_v57 = vld [vmem:[#allocation7 + $0x1d8] sm:$0xff] }
 0xb9d   :  { %3466 = vmatmul.mubr.msk.f32.vlgmr.msra.gmra.mrb[14].mxu0 %vm94_vm1, %v1105_v58  ;;  %3477 = vmatmul.mubr.msk.f32.vlgmr.msra.gmra.mrb[16].mxu1 %vm94_vm1, %v1105_v58  ;;  %v1950_v58 = vld [vmem:[#allocation7 + $0x1e0] sm:$0xff] }
 0xb9e   :  { %3481 = vmatprep.mubr.msk.f32.mxu0 %vm3930_vm0, %v3931_v1  ;;  %3486 = vmatprep.mubr.msk.f32.mxu1 %vm3930_vm0, %v3931_v1 }
 0xbb0   :  { %v1668_v4 = vpop.permute.xlu1 %1667 }
 0xc70   :  { %v1427_v61 = vpop.f32.mrb[14].mxu0  ;;  %v1502_v62 = vpop.f32.mrb[16].mxu1 }
 0xc71   :  { %v3478_v63 = vpop.f32.mrb[17].mxu1  ;;  %3485 = vmatpush3.msra.mxu1 %v1502_v62  ;;  %1669 = vrot.lane.b32.xlu0 %v1427_v61, %s3932_s6  ;;  %v3467_v2 = vpop.f32.mrb[15].mxu0 }
 0xc72   :  { %3480 = vmatpush3.xpose.msk.msra.mxu0 %vm475_vm2, %v1427_v61  ;;  %3494 = vmatprep.subr.mxu1 %v3931_v1 }
 0xc73   :  { %3489 = vmatprep.subr.mxu0 %v3931_v1 }
 0xc75   :  { %3482 = vmatmul.mubr.msk.f32.vlgmr.msra.gmra.mrb[16].mxu0 %vm475_vm2, %v1349_v59  ;;  %v1951_v59 = vld [vmem:[#allocation7 + $0x1e8] sm:$0xff] }
 0xc76   :  { %3491 = vmatprep.mubr.msk.f32.mxu0 %vm3930_vm0, %v3931_v1  ;;  %v3714_v60 = vpack.c.bf16 %v1951_v59, %v1950_v58 }
 0xce3   :  { %v1670_v3 = vpop.permute.xlu0 %1669 }
 0xce4   :  { %3490 = vmatpush3.xpose.msk.msra.mxu0 %vm475_vm2, %v1670_v3  ;;  %v3150_v3 = vld [vmem:[#allocation8 + $0xa] ss:$0 sm:$0xff] }
 0xce5   :  { %3701 = vmatprep.subr.bf16.mxu0 %v3929_v0 }
 0xce7   :  { %3492 = vmatmul.mubr.msk.f32.vlgmr.msra.gmra.mrb[18].mxu0 %vm475_vm2, %v1668_v4 }
 0xce8   :  { %3507 = vmatprep.mubr.msk.f32.mxu0 %vm3930_vm0, %v3931_v1  ;;  %3703 = vmatpush3.bf16.msra.mxu0 %v3702_v34  ;;  %v2139_v34 = vrot.slane %v2137_v33, 4 }
 0xce9   :  { %3704 = vmatprep.subr.bf16.mxu0 %v3929_v0 }
 0xcec   :  { %3706 = vmatpush3.bf16.msra.mxu0 %v3705_v36  ;;  %v2228_v36 = vld [vmem:[#allocation7 + $0x228] sm:$0xff] }
 0xced   :  { %3713 = vmatprep.subr.bf16.mxu0 %v3929_v0 }
 0xd48   :  { %v1578_v6 = vpop.f32.mrb[16].mxu0 }
 0xd49   :  { %v1579_v7 = vadd.f32 %v1578_v6, %v1274_v5  ;;  %v3483_v8 = vpop.f32.mrb[17].mxu0 }
 0xd4a   :  { %v1952_v8 = vld [vmem:[#allocation7 + $0x1f0] sm:$0xff] }
 0xd4b   :  { %v1583_v9 = vsel %vm1582_vm4, %v1579_v7, -inf }
 0xd4c   :  { %1584 = vmax.xlane.f32.xlu0 %v1583_v9  ;;  %v1953_v9 = vld [vmem:[#allocation7 + $0x1f8] sm:$0xff] }
 0xdba   :  { %v1741_v10 = vpop.f32.mrb[18].mxu0 }
 0xdbb   :  { %v1742_v11 = vadd.f32 %v1741_v10, %v1274_v5  ;;  %v3493_v12 = vpop.f32.mrb[19].mxu0  ;;  %v3151_v5 = vld [vmem:[#allocation8 + $0xb] ss:$0 sm:$0xff]  ;;  %v3717_v10 = vpack.c.bf16 %v1953_v9, %v1952_v8 }
 0xdbd   :  { %v1745_v13 = vsel %vm1582_vm4, %v1742_v11, -inf }
 0xdbe   :  { %1746 = vmax.xlane.f32.xlu1 %v1745_v13 }
 0xdd9   :  { %v1585_v14 = vpop.xlane.xlu0 %1584 }
 0xdda   :  { %v1586_v15 = vsub.f32 %v1579_v7, %v1585_v14 }
 0xddc   :  { %v1587_v16 = vmul.f32 1.442695, %v1586_v15 }
 0xdde   :  { %3781 = vpow2.f32 %v1587_v16  ;;  %v3154_v16 = vld [vmem:[#allocation8 + $0xd] ss:$0 sm:$0xff] }
 0xde8   :  { %v3782_v17 = vpop.eup %3781 }
 0xde9   :  { %v1589_v18 = vsel %vm1582_vm4, %v3782_v17, 0.0 }
 0xdea   :  { %1590 = vadd.xlane.f32.xlu0 %v1589_v18 }
 0xe4b   :  { %v1747_v19 = vpop.xlane.xlu1 %1746 }
 0xe4c   :  { %v1748_v20 = vsub.f32 %v1742_v11, %v1747_v19  ;;  %v3152_v11 = vld [vmem:[#allocation8 + $0xc] ss:$0 sm:$0xff] }
 0xe4e   :  { %v1749_v21 = vmul.f32 1.442695, %v1748_v20 }
 0xe50   :  { %3783 = vpow2.f32 %v1749_v21 }
 0xe5a   :  { %v3784_v22 = vpop.eup %3783 }
 0xe5b   :  { %v1751_v23 = vsel %vm1582_vm4, %v3784_v22, 0.0 }
 0xe5c   :  { %1752 = vadd.xlane.f32.xlu0 %v1751_v23 }
 0xe72   :  { %1757 = vrot.lane.b32.xlu0 %v1502_v62, %s3932_s6 }
 0xe77   :  { %v1591_v24 = vpop.xlane.xlu0 %1590 }
 0xe78   :  { %3785 = vrcp.f32 %v1591_v24 }
 0xe82   :  { %v3786_v25 = vpop.eup %3785 }
 0xe83   :  { %v1593_v26 = vmul.f32 %v3786_v25, %v3782_v17 }
 0xe85   :  { %3487 = vmatmul.mubr.msk.f32.vlgmr.msra.gmra.mrb[18].mxu1 %vm552_vm3, %v1593_v26 }
 0xe86   :  { %3496 = vmatprep.mubr.msk.f32.mxu1 %vm3930_vm0, %v3931_v1 }
 0xee9   :  { %v1753_v27 = vpop.xlane.xlu0 %1752 }
 0xeea   :  { %3787 = vrcp.f32 %v1753_v27  ;;  %v2149_v27 = vld [vmem:[#allocation7 + $0x200] sm:$0xff] }
 0xeed   :  { %v1758_v28 = vpop.permute.xlu0 %1757 }
 0xeee   :  { %3495 = vmatpush3.msra.mxu1 %v1758_v28  ;;  %v2150_v28 = vld [vmem:[#allocation7 + $0x208] sm:$0xff] }
 0xeef   :  { %3707 = vmatprep.subr.bf16.mxu1 %v3929_v0 }
 0xef4   :  { %v3788_v29 = vpop.eup %3787 }
 0xef5   :  { %v1755_v30 = vmul.f32 %v3788_v29, %v3784_v22  ;;  %v3720_v29 = vpack.c.bf16 %v2150_v28, %v2149_v27 }
 0xef7   :  { %3497 = vmatmul.mubr.msk.f32.vlgmr.msra.gmra.mrb[20].mxu1 %vm552_vm3, %v1755_v30  ;;  %v2151_v30 = vld [vmem:[#allocation7 + $0x210] sm:$0xff] }
 0xef8   :  { %3518 = vmatprep.mubr.msk.f32.mxu1 %vm3930_vm0, %v3931_v1  ;;  %3709 = vmatpush3.bf16.msra.mxu1 %v3708_v55  ;;  %v3723_v32 = vpack.c.bf16 %v2152_v31, %v2151_v30  ;;  %v3157_v55 = vld [vmem:[#allocation8 + $0xf] ss:$0 sm:$0xff]  ;;  %v2716_v31 = vld [vmem:[#allocation7 + $0x260] sm:$0xff] }
 0xef9   :  { %3710 = vmatprep.subr.bf16.mxu1 %v3929_v0 }
 0xf58   :  { %v1663_v38 = vpop.f32.mrb[18].mxu1 }
 0xf59   :  { %v3488_v40 = vpop.f32.mrb[19].mxu1 }
 0xf5a   :  { %v3726_v40 = vpack.c.bf16 %v2228_v36, %v2227_v35  ;;  %v2719_v35 = vld [vmem:[#allocation7 + $0x278] sm:$0xff] }
 0xfca   :  { %v1829_v37 = vpop.f32.mrb[20].mxu1 }
 0xfcb   :  { %1834 = vrot.lane.b32.xlu1 %v1829_v37, %s3933_s24  ;;  %v3498_v41 = vpop.f32.mrb[21].mxu1  ;;  %v2306_v37 = vld [vmem:[#allocation7 + $0x248] sm:$0xff] }
 0xfcc   :  { %v4190_v41 = vsel %vm2141_vm6, %v2137_v33, %v2139_v34 }
0x103d   :  { %v1835_v42 = vpop.permute.xlu1 %1834 }
0x103e   :  { %v1837_v43 = vsel %vm475_vm2, %v1663_v38, %v1835_v42  ;;  %v2305_v38 = vld [vmem:[#allocation7 + $0x240] sm:$0xff] }
0x103f   :  { %3508 = vmatmul.mubr.msk.f32.vlgmr.msra.gmra.mrb[20].mxu0 %vm94_vm1, %v1837_v43  ;;  %v3732_v42 = vpack.c.bf16 %v2306_v37, %v2305_v38  ;;  %v2229_v43 = vld [vmem:[#allocation7 + $0x230] sm:$0xff] }
0x1040   :  { %3529 = vmatprep.mubr.msk.f32.mxu0 %vm3930_vm0, %v3931_v1  ;;  %3715 = vmatpush3.bf16.msra.mxu0 %v3714_v60 }
0x1041   :  { %3716 = vmatprep.subr.bf16.mxu0 %v3929_v0 }
0x1044   :  { %3718 = vmatpush3.bf16.msra.mxu0 %v3717_v10 }
0x1045   :  { %3725 = vmatprep.subr.bf16.mxu0 %v3929_v0 }
0x1112   :  { %v1912_v44 = vpop.f32.mrb[20].mxu0 }
0x1113   :  { %v1916_v45 = vadd.f32 %v1912_v44, %v4122_v39  ;;  %v3509_v46 = vpop.f32.mrb[21].mxu0  ;;  %v3711_v39 = vpack.c.bf16 %v1947_v57, %v1946_v56  ;;  %v2230_v44 = vld [vmem:[#allocation7 + $0x238] sm:$0xff]  ;;  %v2143_v57 = vrot.slane %v2137_v33, 6  ;;  %v2718_v33 = vld [vmem:[#allocation7 + $0x270] sm:$0xff] }
0x1114   :  { %v3729_v46 = vpack.c.bf16 %v2230_v44, %v2229_v43  ;;  %v3741_v36 = vpack.c.bf16 %v2719_v35, %v2718_v33  ;;  %v3177_v33 = vld [vmem:[#allocation8 + $0x15] ss:$0 sm:$0xff] }
0x1115   :  { %v1920_v47 = vsel %vm1919_vm5, %v1916_v45, 0.0  ;;  %3712 = vmatpush3.bf16.msra.mxu1 %v3711_v39 }
0x1116   :  { %1921 = vadd.xlane.f32.xlu0 %v1920_v47  ;;  %3719 = vmatprep.subr.bf16.mxu1 %v3929_v0  ;;  %v2308_v47 = vld [vmem:[#allocation7 + $0x258] sm:$0xff] }
0x11a3   :  { %v1922_v48 = vpop.xlane.xlu0 %1921 }
0x11a4   :  { %v1923_v49 = vmul.f32 0.03125, %v1922_v48 }
0x11a6   :  { %v1924_v50 = vsub.f32 %v1916_v45, %v1923_v49  ;;  %v2307_v45 = vld [vmem:[#allocation7 + $0x250] sm:$0xff] }
0x11a7   :  { %v3735_v48 = vpack.c.bf16 %v2308_v47, %v2307_v45 }
0x11a8   :  { %v1925_v51 = vmul.f32 %v1924_v50, %v1924_v50 }
0x11aa   :  { %v1926_v52 = vsel %vm1919_vm5, %v1925_v51, 0.0 }
0x11ab   :  { %1927 = vadd.xlane.f32.xlu1 %v1926_v52 }
0x1238   :  { %v1928_v61 = vpop.xlane.xlu1 %1927 }
0x1239   :  { %v1929_v62 = vmul.f32 0.03125, %v1928_v61 }
0x123b   :  { %v1930_v63 = vadd.f32 1e-05, %v1929_v62 }
0x123d   :  { %3789 = vrsqrt.f32 %v1930_v63 }
0x1247   :  { %v3790_v2 = vpop.eup %3789 }
0x1248   :  { %v1932_v4 = vmul.f32 %v3790_v2, %v1924_v50 }
0x124a   :  { %v1937_v6 = vmul.f32 %v3150_v3, %v1932_v4 }
0x124c   :  { %v1942_v7 = vadd.f32 %v3151_v5, %v1937_v6  ;;  %v2147_v5 = vld [vmem:[%s4273_s4] sm:$0xff]  ;;  %s3935_s4 = smov [#allocation10]  }
0x124d   :  { %s3103_s30 = sshll.u32 %s3935_s4, 4  ;;  %s3104_s30 = int_to_ptr.vmem [resolvable:$true] %s3103_s30 }
0x124e   :  { %3519 = vmatmul.mubr.msk.f32.vlgmr.msra.gmra.mrb[22].mxu1 %vm94_vm1, %v1942_v7  ;;  %s3893_s8 = scalar_lea.vmem %s3104_s30, 16  ;;  %s3897_s9 = scalar_lea.vmem %s3104_s30, 32 }
0x124f   :  { %3540 = vmatprep.mubr.msk.f32.mxu1 %vm3930_vm0, %v3931_v1  ;;  %3721 = vmatpush3.bf16.msra.mxu1 %v3720_v29  ;;  %p3894_p4 = scmp.ne.s32.totalorder %s3104_s30, %s3893_s8  ;;  %p3898_p5 = scmp.lt.s32.totalorder %s3104_s30, %s3104_s30 }
0x1250   :  { %3722 = vmatprep.subr.bf16.mxu1 %v3929_v0  ;;  %p3899_p6 = scmp.lt.s32.totalorder %s3897_s9, %s3893_s8 }
0x1252   :  { %p3900_p7 = por %p3899_p6, %p3898_p5 }
0x1253   :  { %3724 = vmatpush3.bf16.msra.mxu1 %v3723_v32  ;;  %v2717_v32 = vld [vmem:[#allocation7 + $0x268] sm:$0xff] }
0x1254   :  { %3731 = vmatprep.subr.bf16.mxu1 %v3929_v0  ;;  %v3738_v34 = vpack.c.bf16 %v2717_v32, %v2716_v31  ;;  %v3176_v31 = vld [vmem:[#allocation8 + $0x14] ss:$0 sm:$0xff]  ;;  %p3901_p8 = pnand %p3900_p7, %p3894_p4 }
0x1256   :  { %3541 = vmatmul.mubr.msk.f32.vlgmr.msra.gmra.mrb[24].mxu1 %vm94_vm1, %v4190_v41 }
0x1257   :  { %3733 = vmatpush3.bf16.msra.mxu1 %v3732_v42  ;;  %3562 = vmatprep.mubr.msk.f32.mxu1 %vm3930_vm0, %v3931_v1 }
0x1258   :  { %3734 = vmatprep.subr.bf16.mxu1 %v3929_v0 }
0x125b   :  { %3736 = vmatpush3.bf16.msra.mxu1 %v3735_v48 }
0x125c   :  { %3570 = vmatprep.subr.mxu1 %v3931_v1 }
0x1321   :  { %v2028_v12 = vpop.f32.mrb[22].mxu1 }
0x1322   :  { %v2029_v13 = vadd.f32 %v3152_v11, %v2028_v12  ;;  %v3520_v14 = vpop.f32.mrb[23].mxu1 }
0x1324   :  { %v2032_v15 = vmax.f32 %v2029_v13, 0.0 }
0x1326   :  { %3530 = vmatmul.mubr.msk.f32.vlgmr.msra.gmra.mrb[22].mxu0 %vm94_vm1, %v2032_v15 }
0x1327   :  { %3551 = vmatprep.mubr.msk.f32.mxu0 %vm3930_vm0, %v3931_v1  ;;  %3727 = vmatpush3.bf16.msra.mxu0 %v3726_v40 }
0x1328   :  { %3728 = vmatprep.subr.bf16.mxu0 %v3929_v0 }
0x1329   :  { %v2222_v59 = vpop.f32.mrb[24].mxu1 }
0x132a   :  { %v3542_v60 = vpop.f32.mrb[25].mxu1  ;;  %2544 = vrot.lane.b32.xlu1 %v2222_v59, %s3932_s6 }
0x132b   :  { %3730 = vmatpush3.bf16.msra.mxu0 %v3729_v46 }
0x132c   :  { %3565 = vmatprep.subr.mxu0 %v3931_v1 }
0x139c   :  { %v2545_v4 = vpop.permute.xlu1 %2544 }
0x13f9   :  { %v2106_v17 = vpop.f32.mrb[22].mxu0 }
0x13fa   :  { %v2107_v18 = vadd.f32 %v3154_v16, %v2106_v17  ;;  %v3531_v19 = vpop.f32.mrb[23].mxu0 }
0x13fc   :  { %v2110_v20 = vadd.f32 %v2107_v18, %v1942_v7 }
0x13fe   :  { %v2113_v21 = vsel %vm1919_vm5, %v2110_v20, 0.0 }
0x13ff   :  { %2114 = vadd.xlane.f32.xlu0 %v2113_v21 }
0x148c   :  { %v2115_v22 = vpop.xlane.xlu0 %2114 }
0x148d   :  { %v2116_v23 = vmul.f32 0.03125, %v2115_v22 }
0x148f   :  { %v2117_v24 = vsub.f32 %v2110_v20, %v2116_v23 }
0x1491   :  { %v2118_v25 = vmul.f32 %v2117_v24, %v2117_v24 }
0x1493   :  { %v2119_v26 = vsel %vm1919_vm5, %v2118_v25, 0.0 }
0x1494   :  { %2120 = vadd.xlane.f32.xlu0 %v2119_v26 }
0x1521   :  { %v2121_v49 = vpop.xlane.xlu0 %2120 }
0x1522   :  { %v2122_v50 = vmul.f32 0.03125, %v2121_v49 }
0x1524   :  { %v2123_v51 = vadd.f32 1e-05, %v2122_v50 }
0x1526   :  { %3791 = vrsqrt.f32 %v2123_v51 }
0x1530   :  { %v3792_v52 = vpop.eup %3791 }
0x1531   :  { %v2125_v54 = vmul.f32 %v3792_v52, %v2117_v24 }
0x1533   :  { %v2130_v56 = vmul.f32 %v3156_v53, %v2125_v54  ;;  %v2820_v54 = vld [vmem:[#allocation7 + $0x280] sm:$0xff] }
0x1535   :  { %v2135_v39 = vadd.f32 %v3157_v55, %v2130_v56  ;;  %v2821_v55 = vld [vmem:[#allocation7 + $0x288] sm:$0xff] }
0x1536   :  { %v3744_v56 = vpack.c.bf16 %v2821_v55, %v2820_v54 }
0x1537   :  { %v2146_v58 = vsel %vm2145_vm7, %v2135_v39, %v2143_v57  ;;  %v2822_v57 = vld [vmem:[#allocation7 + $0x290] sm:$0xff]  ;;  %v2823_v39 = vld [vmem:[#allocation7 + $0x298] sm:$0xff] }
0x1538   :  { %3552 = vmatmul.mubr.msk.f32.vlgmr.msra.gmra.mrb[24].mxu0 %vm94_vm1, %v2146_v58  ;;  %3563 = vmatmul.mubr.msk.f32.vlgmr.msra.gmra.mrb[26].mxu1 %vm94_vm1, %v2146_v58  ;;  %v3747_v58 = vpack.c.bf16 %v2823_v39, %v2822_v57 }
0x1539   :  { %3567 = vmatprep.mubr.msk.f32.mxu0 %vm3930_vm0, %v3931_v1  ;;  %3572 = vmatprep.mubr.msk.f32.mxu1 %vm3930_vm0, %v3931_v1 }
0x160b   :  { %v2300_v61 = vpop.f32.mrb[24].mxu0  ;;  %v2375_v62 = vpop.f32.mrb[26].mxu1 }
0x160c   :  { %v3564_v63 = vpop.f32.mrb[27].mxu1  ;;  %3571 = vmatpush3.msk.msra.mxu1 %vm2470_vm8, %v2375_v62  ;;  %2546 = vrot.lane.b32.xlu0 %v2300_v61, %s3932_s6  ;;  %v3553_v2 = vpop.f32.mrb[25].mxu0 }
0x160d   :  { %3566 = vmatpush3.xpose.msk.msra.mxu0 %vm475_vm2, %v2300_v61  ;;  %3580 = vmatprep.subr.mxu1 %v3931_v1 }
0x160e   :  { %3575 = vmatprep.subr.mxu0 %v3931_v1 }
0x1610   :  { %3568 = vmatmul.mubr.msk.f32.vlgmr.msra.gmra.mrb[26].mxu0 %vm475_vm2, %v2222_v59  ;;  %v2827_v59 = vld [vmem:[#allocation7 + $0x2a8] sm:$0xff] }
0x1611   :  { %3577 = vmatprep.mubr.msk.f32.mxu0 %vm3930_vm0, %v3931_v1 }
0x167e   :  { %v2547_v3 = vpop.permute.xlu0 %2546 }
0x167f   :  { %3576 = vmatpush3.xpose.msk.msra.mxu0 %vm475_vm2, %v2547_v3  ;;  %v3170_v3 = vld [vmem:[#allocation8 + $0x10] ss:$0 sm:$0xff] }
0x1680   :  { %3737 = vmatprep.subr.bf16.mxu0 %v3929_v0 }
0x1682   :  { %3578 = vmatmul.mubr.msk.f32.vlgmr.msra.gmra.mrb[28].mxu0 %vm475_vm2, %v2545_v4 }
0x1683   :  { %3593 = vmatprep.mubr.msk.f32.mxu0 %vm3930_vm0, %v3931_v1  ;;  %3739 = vmatpush3.bf16.msra.mxu0 %v3738_v34 }
0x1684   :  { %3740 = vmatprep.subr.bf16.mxu0 %v3929_v0 }
0x1687   :  { %3742 = vmatpush3.bf16.msra.mxu0 %v3741_v36  ;;  %v3012_v36 = vld [vmem:[#allocation8 + $0x16] sm:$0x1] }
0x1688   :  { %3749 = vmatprep.subr.bf16.mxu0 %v3929_v0 }
0x16e3   :  { %v2451_v6 = vpop.f32.mrb[26].mxu0 }
0x16e4   :  { %v2452_v7 = vadd.f32 %v2451_v6, %v2147_v5  ;;  %v3569_v8 = vpop.f32.mrb[27].mxu0 }
0x16e5   :  { %v2828_v8 = vld [vmem:[#allocation7 + $0x2b0] sm:$0xff] }
0x16e6   :  { %v2456_v9 = vsel %vm2455_vm9, %v2452_v7, -inf }
0x16e7   :  { %2457 = vmax.xlane.f32.xlu1 %v2456_v9  ;;  %v2829_v9 = vld [vmem:[#allocation7 + $0x2b8] sm:$0xff] }
0x1755   :  { %v2618_v10 = vpop.f32.mrb[28].mxu0 }
0x1756   :  { %v2619_v11 = vadd.f32 %v2618_v10, %v2147_v5  ;;  %v3579_v12 = vpop.f32.mrb[29].mxu0  ;;  %v3171_v5 = vld [vmem:[#allocation8 + $0x11] ss:$0 sm:$0xff]  ;;  %v3753_v10 = vpack.c.bf16 %v2829_v9, %v2828_v8 }
0x1758   :  { %v2622_v13 = vsel %vm2455_vm9, %v2619_v11, -inf }
0x1759   :  { %2623 = vmax.xlane.f32.xlu0 %v2622_v13 }
0x1774   :  { %v2458_v14 = vpop.xlane.xlu1 %2457 }
0x1775   :  { %v2459_v15 = vsub.f32 %v2452_v7, %v2458_v14 }
0x1777   :  { %v2460_v16 = vmul.f32 1.442695, %v2459_v15  ;;  %v3174_v15 = vld [vmem:[#allocation8 + $0x13] ss:$0 sm:$0xff] }
0x1779   :  { %3793 = vpow2.f32 %v2460_v16 }
0x1783   :  { %v3794_v17 = vpop.eup %3793 }
0x1784   :  { %v2462_v18 = vsel %vm2455_vm9, %v3794_v17, 0.0 }
0x1785   :  { %2463 = vadd.xlane.f32.xlu0 %v2462_v18 }
0x179b   :  { %2633 = vrot.lane.b32.xlu0 %v2375_v62, %s3932_s6 }
0x17e6   :  { %v2624_v19 = vpop.xlane.xlu0 %2623 }
0x17e7   :  { %v2625_v20 = vsub.f32 %v2619_v11, %v2624_v19 }
0x17e9   :  { %v2626_v21 = vmul.f32 1.442695, %v2625_v20 }
0x17eb   :  { %3795 = vpow2.f32 %v2626_v21 }
0x17f5   :  { %v3796_v22 = vpop.eup %3795 }
0x17f6   :  { %v2628_v23 = vsel %vm2455_vm9, %v3796_v22, 0.0 }
0x17f7   :  { %2629 = vadd.xlane.f32.xlu1 %v2628_v23 }
0x1812   :  { %v2464_v24 = vpop.xlane.xlu0 %2463 }
0x1813   :  { %3797 = vrcp.f32 %v2464_v24 }
0x1816   :  { %v2634_v27 = vpop.permute.xlu0 %2633 }
0x181d   :  { %v3798_v25 = vpop.eup %3797 }
0x181e   :  { %v2466_v26 = vmul.f32 %v3798_v25, %v3794_v17  ;;  %v3013_v25 = vld [vmem:[#allocation8 + $0x17] sm:$0x1] }
0x1820   :  { %3573 = vmatmul.mubr.msk.f32.vlgmr.msra.gmra.mrb[28].mxu1 %vm2455_vm9, %v2466_v26  ;;  %v3934_v26 = vmov 0  }
0x1821   :  { %3581 = vmatpush3.msk.msra.mxu1 %vm2470_vm8, %v2634_v27  ;;  %3582 = vmatprep.mubr.msk.f32.mxu1 %vm3930_vm0, %v3931_v1 }
0x1822   :  { %3743 = vmatprep.subr.bf16.mxu1 %v3929_v0  ;;  %3768 = vset.pattern.permute.xlu0 %v3934_v26 }
0x1884   :  { %v2630_v28 = vpop.xlane.xlu1 %2629 }
0x1885   :  { %3799 = vrcp.f32 %v2630_v28 }
0x188f   :  { %v3800_v29 = vpop.eup %3799 }
0x1890   :  { %v2632_v30 = vmul.f32 %v3800_v29, %v3796_v22 }
0x1892   :  { %3583 = vmatmul.mubr.msk.f32.vlgmr.msra.gmra.mrb[30].mxu1 %vm2455_vm9, %v2632_v30 }
0x1893   :  { %3604 = vmatprep.mubr.msk.f32.mxu1 %vm3930_vm0, %v3931_v1  ;;  %3745 = vmatpush3.bf16.msra.mxu1 %v3744_v56 }
0x1894   :  { %3746 = vmatprep.subr.bf16.mxu1 %v3929_v0 }
0x1897   :  { %3748 = vmatpush3.bf16.msra.mxu1 %v3747_v58 }
0x1898   :  { %3618 = vmatprep.subr.mxu1 %v3931_v1 }
0x18f3   :  { %v2540_v38 = vpop.f32.mrb[28].mxu1 }
0x18f4   :  { %v3574_v40 = vpop.f32.mrb[29].mxu1 }
0x1965   :  { %v2706_v37 = vpop.f32.mrb[30].mxu1 }
0x1966   :  { %2711 = vrot.lane.b32.xlu1 %v2706_v37, %s3933_s24  ;;  %v3584_v42 = vpop.f32.mrb[31].mxu1 }
0x19d8   :  { %v2712_v43 = vpop.permute.xlu1 %2711 }
0x19d9   :  { %v2714_v44 = vsel %vm475_vm2, %v2540_v38, %v2712_v43 }
0x19da   :  { %3594 = vmatmul.mubr.msk.f32.vlgmr.msra.gmra.mrb[30].mxu0 %vm94_vm1, %v2714_v44 }
0x19db   :  { %3615 = vmatprep.mubr.msk.f32.mxu0 %vm3930_vm0, %v3931_v1 }
0x1aad   :  { %v2789_v45 = vpop.f32.mrb[30].mxu0 }
0x1aae   :  { %v2793_v46 = vadd.f32 %v2789_v45, %v4190_v41  ;;  %v3595_v47 = vpop.f32.mrb[31].mxu0  ;;  %v2826_v41 = vld [vmem:[#allocation7 + $0x2a0] sm:$0xff] }
0x1aaf   :  { %v3750_v60 = vpack.c.bf16 %v2827_v59, %v2826_v41 }
0x1ab0   :  { %v2796_v48 = vsel %vm94_vm1, %v2793_v46, 0.0 }
0x1ab1   :  { %2797 = vadd.xlane.f32.xlu1 %v2796_v48  ;;  %3751 = vmatpush3.bf16.msra.mxu0 %v3750_v60 }
0x1ab2   :  { %3752 = vmatprep.subr.bf16.mxu0 %v3929_v0  ;;  %v3172_v0 = vld [vmem:[#allocation8 + $0x12] ss:$0 sm:$0xff] }
0x1ab5   :  { %3754 = vmatpush3.bf16.msra.mxu0 %v3753_v10 }
0x1b3e   :  { %v2798_v49 = vpop.xlane.xlu1 %2797 }
0x1b3f   :  { %v2799_v50 = vmul.f32 0.03125, %v2798_v49 }
0x1b41   :  { %v2800_v51 = vsub.f32 %v2793_v46, %v2799_v50 }
0x1b43   :  { %v2801_v52 = vmul.f32 %v2800_v51, %v2800_v51 }
0x1b45   :  { %v2802_v53 = vsel %vm94_vm1, %v2801_v52, 0.0 }
0x1b46   :  { %2803 = vadd.xlane.f32.xlu0 %v2802_v53 }
0x1bd3   :  { %v2804_v61 = vpop.xlane.xlu0 %2803 }
0x1bd4   :  { %v2805_v62 = vmul.f32 0.03125, %v2804_v61 }
0x1bd6   :  { %v2806_v63 = vadd.f32 1e-05, %v2805_v62 }
0x1bd8   :  { %3801 = vrsqrt.f32 %v2806_v63 }
0x1be2   :  { %v3802_v2 = vpop.eup %3801 }
0x1be3   :  { %v2808_v4 = vmul.f32 %v3802_v2, %v2800_v51 }
0x1be5   :  { %v2813_v6 = vmul.f32 %v3170_v3, %v2808_v4 }
0x1be7   :  { %v2818_v7 = vadd.f32 %v3171_v5, %v2813_v6 }
0x1be9   :  { %3605 = vmatmul.mubr.msk.f32.vlgmr.msra.gmra.mrb[32].mxu1 %vm94_vm1, %v2818_v7 }
0x1bea   :  { %3620 = vmatprep.mubr.msk.f32.mxu1 %vm3930_vm0, %v3931_v1 }
0x1cbc   :  { %v2904_v11 = vpop.f32.mrb[32].mxu1 }
0x1cbd   :  { %v2905_v12 = vadd.f32 %v3172_v0, %v2904_v11  ;;  %v3606_v13 = vpop.f32.mrb[33].mxu1 }
0x1cbf   :  { %v2908_v14 = vmax.f32 %v2905_v12, 0.0 }
0x1cc1   :  { %3616 = vmatmul.mubr.msk.f32.vlgmr.msra.gmra.mrb[32].mxu0 %vm94_vm1, %v2908_v14 }
0x1d94   :  { %v2982_v16 = vpop.f32.mrb[32].mxu0 }
0x1d95   :  { %v2983_v17 = vadd.f32 %v3174_v15, %v2982_v16  ;;  %v3617_v18 = vpop.f32.mrb[33].mxu0 }
0x1d97   :  { %v2986_v19 = vadd.f32 %v2983_v17, %v2818_v7 }
0x1d99   :  { %v2989_v20 = vsel %vm94_vm1, %v2986_v19, 0.0 }
0x1d9a   :  { %2990 = vadd.xlane.f32.xlu0 %v2989_v20 }
0x1db0   :  { %3016 = vperm.xlu0 %3768, %v3013_v25  }
0x1e27   :  { %v2991_v1 = vpop.xlane.xlu0 %2990 }
0x1e28   :  { %v2992_v21 = vmul.f32 0.03125, %v2991_v1 }
0x1e2a   :  { %v2993_v22 = vsub.f32 %v2986_v19, %v2992_v21 }
0x1e2c   :  { %v2994_v23 = vmul.f32 %v2993_v22, %v2993_v22 }
0x1e2e   :  { %v2995_v24 = vsel %vm94_vm1, %v2994_v23, 0.0 }
0x1e2f   :  { %2996 = vadd.xlane.f32.xlu1 %v2995_v24  ;;  %v3017_v38 = vpop.permute.xlu0 %3016 }
0x1ebc   :  { %v2997_v27 = vpop.xlane.xlu1 %2996 }
0x1ebd   :  { %v2998_v28 = vmul.f32 0.03125, %v2997_v27 }
0x1ebf   :  { %v2999_v29 = vadd.f32 1e-05, %v2998_v28 }
0x1ec1   :  { %3803 = vrsqrt.f32 %v2999_v29 }
0x1ecb   :  { %v3804_v30 = vpop.eup %3803 }
0x1ecc   :  { %v3001_v32 = vmul.f32 %v3804_v30, %v2993_v22 }
0x1ece   :  { %v3006_v34 = vmul.f32 %v3176_v31, %v3001_v32 }
0x1ed0   :  { %v3011_v35 = vadd.f32 %v3177_v33, %v3006_v34 }
0x1ed2   :  { %3619 = vmatpush3.xpose.msk.msra.mxu1 %vm94_vm1, %v3011_v35 }
0x1ed5   :  { %3621 = vmatmul.mubr.msk.f32.vlgmr.msra.gmra.mrb[34].mxu1 %vm94_vm1, %v3012_v36 }
0x1fa8   :  { %v3091_v40 = vpop.f32.mrb[34].mxu1 }
0x1fa9   :  { %v3622_v37 = vpop.f32.mrb[35].mxu1  ;;  %v3092_v42 = vadd.f32 %v3091_v40, %v3017_v38 }
0x1fab   :  { %3096 = vst.msk [vmem:[#allocation10] sm:$0x1] %vm3095_vm10, %v3092_v42 }
0x1fac   :  { %3904 = shalt.err (!%p3901_p8)
}
0x1fad   :  { %s3905_s0 = scalar_lea.hbm %s4276_s7, 16 }
0x1fae   :  { %p3906_p9 = scmp.ne.s32.totalorder %s4276_s7, %s3905_s0  ;;  %p3909_p10 = scmp.lt.u32.totalorder %s3905_s0, %s4276_s7 }
0x1fb0   :  { %p3911_p11 = pnand %p3909_p10, %p3906_p9 }
0x1fb2   :  { %3914 = shalt.err (!%p3911_p11)
}
0x1fb3   :  { %3106 = dma.vmem_to_hbm [thread:$0]  %s3104_s30, 16, %s4276_s7, [#allocation4]  }
0x1fb4   :  { %3921 = dma.done.wait [#allocation4], 16  }
0x1fb5   :  { %3922 = vsyncadd [#allocation4], 4294967280 }
0x1fb6   :  { %3110 = vsyncpa [#allocation3], 1 }
0x1fb7   :  { %3111 = vsyncpa [#allocation6], 1 }
0x1fb8   :  { %3112 = vsyncpa [#allocation9], 1 }
0x1fb9   :  { %3113 = vsyncpa [#allocation4], 1 }

</bundles_post_ra>
